<compile_context>
chip_gen: v7x
topology: tpu7x:2x2x1
jax: 0.10.0
libtpu: 0.0.40
codegen_flags: <defaults>
</compile_context>

<pallas_src>
import math
import jax
import jax.numpy as jnp
from jax.experimental import pallas as pl
from jax.experimental.pallas import tpu as pltpu


def _layer_norm(h, gamma, beta, eps=1e-5):
    # One-pass LayerNorm: h (rows, D) f32; gamma/beta (1, D) f32. Biased variance like torch.
    mean = jnp.mean(h, axis=-1, keepdims=True)
    mean_sq = jnp.mean(h * h, axis=-1, keepdims=True)
    var = mean_sq - mean * mean
    return (h - mean) * jax.lax.rsqrt(var + eps) * gamma + beta


def _linear_t(h, w, b):
    # h: (rows, in); w: (out, in) [torch nn.Linear layout]; b: (1, out) f32.
    # Contract h's last dim against w's last dim (== h @ w.T) without a materialized transpose.
    out = jax.lax.dot_general(h, w, dimension_numbers=(((1,), (1,)), ((), ())),
                              preferred_element_type=jnp.float32)
    return out + b


def make_transformer_block_kernel(num_heads, seq_len, d_model, dim_ff, batch_tile,
                                  ff_chunk, compute_dtype):
    d_k = d_model // num_heads
    inv_scale = 1.0 / math.sqrt(d_k)
    S, Bt, D = seq_len, batch_tile, d_model
    rows = Bt * S

    def kernel(x_ref,
               wq_ref, bq_ref, wk_ref, bk_ref, wv_ref, bv_ref, wo_ref, bo_ref,
               g1_ref, be1_ref, w1_ref, b1_ref, w2_ref, b2_ref, g2_ref, be2_ref,
               out_ref, ctx_ref):
        # (Bt, S, D) block -> (Bt*S, D) row slab (contiguous reshape, no relayout).
        x_c = x_ref[...].reshape(rows, D).astype(compute_dtype)

        # --- Q/K/V projections: one (rows, D) x (D, D)^T matmul each, f32 accumulation.
        Q = _linear_t(x_c, wq_ref[...], bq_ref[...])
        K = _linear_t(x_c, wk_ref[...], bk_ref[...])
        V = _linear_t(x_c, wv_ref[...], bv_ref[...])

        # Cast once; fold 1/sqrt(d_k) into Q once; split the row dim back out (free reshape).
        Qc = (Q * inv_scale).astype(compute_dtype).reshape(Bt, S, D)
        Kc = K.astype(compute_dtype).reshape(Bt, S, D)
        Vc = V.astype(compute_dtype).reshape(Bt, S, D)

        # --- Multi-head attention, batched over the batch tile per head. Each head's context
        # is written directly into the VMEM scratch (no concatenates, bounded live ranges).
        # TODO(synk): for long sequences, tile over KV blocks with an online softmax
        # (flash-style running max/denominator) instead of full (S, S) scores per head.
        for h in range(num_heads):
            lo = h * d_k
            qh = Qc[:, :, lo:lo + d_k]
            kh = Kc[:, :, lo:lo + d_k]
            vh = Vc[:, :, lo:lo + d_k]
            s = jnp.einsum("bqd,bkd->bqk", qh, kh,
                           preferred_element_type=jnp.float32)            # (Bt, S, S) f32
            s = s - jnp.max(s, axis=-1, keepdims=True)
            p = jnp.exp(s)
            inv_l = pl.reciprocal(jnp.sum(p, axis=-1, keepdims=True), approx=True)  # EUP
            ctx_h = jnp.einsum("bqk,bkd->bqd", p.astype(compute_dtype), vh,
                               preferred_element_type=jnp.float32) * inv_l
            ctx_ref[:, :, lo:lo + d_k] = ctx_h.astype(ctx_ref.dtype)

        # --- Fused output projection: single (rows, D) x (D, D)^T matmul over all heads.
        a = _linear_t(ctx_ref[...].reshape(rows, D), wo_ref[...], bo_ref[...])

        # --- residual (re-read x from the VMEM ref) + LayerNorm 1 (f32).
        x_res = x_ref[...].reshape(rows, D).astype(jnp.float32)
        x2 = _layer_norm(x_res + a, g1_ref[...], be1_ref[...])

        # --- feed-forward, tiled over dim_ff: Linear -> ReLU -> Linear, f32 accumulation.
        x2_c = x2.astype(compute_dtype)
        f = jnp.zeros((rows, D), jnp.float32)
        for c0 in range(0, dim_ff, ff_chunk):
            c1 = min(c0 + ff_chunk, dim_ff)
            h1 = jax.lax.dot_general(x2_c, w1_ref[c0:c1, :],
                                     dimension_numbers=(((1,), (1,)), ((), ())),
                                     preferred_element_type=jnp.float32)
            h1 = jnp.maximum(h1 + b1_ref[:, c0:c1], 0.0).astype(compute_dtype)
            f = f + jax.lax.dot_general(h1, w2_ref[:, c0:c1],
                                        dimension_numbers=(((1,), (1,)), ((), ())),
                                        preferred_element_type=jnp.float32)
        f = f + b2_ref[...]

        # --- residual + LayerNorm 2.
        out = _layer_norm(x2 + f, g2_ref[...], be2_ref[...])
        out_ref[...] = out.reshape(Bt, S, D).astype(out_ref.dtype)

    return kernel


def _auto_batch_tile(batch, seq_len, target_rows=256):
    """Smallest batch tile whose row slab fills the MXU (>= target_rows rows) while keeping
    at least 2 grid steps when possible (v7x has 2 TensorCores)."""
    divisors = [d for d in range(1, batch + 1) if batch % d == 0]
    for d in divisors:
        if d * seq_len >= target_rows and (batch // d >= 2 or d == batch):
            return d
    for d in reversed(divisors):
        if batch // d >= 2:
            return d
    return batch


def _vmem_limit_bytes(rows, S, D, dim_ff, ff_chunk, batch_tile, compute_dtype, param_arrays):
    f32 = 4
    c = jnp.dtype(compute_dtype).itemsize
    weights = sum(math.prod(a.shape) * a.dtype.itemsize for a in param_arrays)
    io_blocks = 2 * 2 * rows * D * f32                 # double-buffered input + output blocks
    ctx_scratch = rows * D * c
    work = (8 * rows * D * f32                         # Q/K/V/a/x2/f + headroom
            + 2 * batch_tile * S * S * f32             # scores + probs for one head
            + 2 * rows * min(ff_chunk, dim_ff) * f32)  # one FFN chunk
    needed = weights + io_blocks + ctx_scratch + work
    try:
        ceiling = int(pltpu.get_tpu_info().vmem_capacity_bytes * 0.85)
    except Exception:
        ceiling = 64 * 1024 * 1024                     # safe ceiling on every generation
    return int(min(ceiling, max(2 * needed, 32 * 1024 * 1024)))


def transformer_block_pallas(x, params, num_heads, *, batch_tile=None,
                             compute_dtype=jnp.float32, ff_chunk=None):
    """x: (S, B, D) float32 (seq-first, like the PyTorch module). Returns (S, B, D) f32.

    compute_dtype: MXU-operand dtype (f32 accumulation / softmax / LayerNorm always).
        Use jnp.bfloat16 on v6e/v7x for ~2x matmul throughput and half the weight traffic.
    batch_tile:   batch elements per grid step (None -> auto: >=256-row slabs when possible,
        keeping the grid >= 2 so both v7x TensorCores get work).
    ff_chunk:     dim_ff tile for the feed-forward (bounds the (rows, dim_ff) intermediate).
    """
    S, B, D = x.shape
    assert D % num_heads == 0
    dim_ff = params["w1"].shape[0]
    if batch_tile is None:
        batch_tile = _auto_batch_tile(B, S)
    assert B % batch_tile == 0, "batch_tile must divide batch"
    if ff_chunk is None:
        ff_chunk = 512 if (dim_ff > 1024 and dim_ff % 512 == 0) else dim_ff
    rows = batch_tile * S

    # Batch-first for (8,128)-friendly activation blocks; weights stay in torch (out, in)
    # layout (no wrapper-side weight transposes -> no extra HBM passes).
    xb = jnp.transpose(x, (1, 0, 2))                              # (B, S, D)
    cw = lambda w: jnp.asarray(w, compute_dtype)                  # matmul operands
    b2d = lambda b: jnp.asarray(b, jnp.float32).reshape(1, -1)    # biases / LN params (f32)

    args = (
        xb,
        cw(params["wq"]), b2d(params["bq"]),
        cw(params["wk"]), b2d(params["bk"]),
        cw(params["wv"]), b2d(params["bv"]),
        cw(params["wo"]), b2d(params["bo"]),
        b2d(params["g1"]), b2d(params["be1"]),
        cw(params["w1"]), b2d(params["b1"]),
        cw(params["w2"]), b2d(params["b2"]),
        b2d(params["g2"]), b2d(params["be2"]),
    )

    kernel = make_transformer_block_kernel(num_heads, S, D, dim_ff, batch_tile,
                                           ff_chunk, compute_dtype)

    # Advisory cost estimate so XLA schedules neighbouring ops sensibly around the call.
    flops = 2 * B * S * (4 * D * D + 2 * D * dim_ff) + 4 * B * S * S * D
    transcendentals = B * num_heads * S * S + B * num_heads * S + 2 * B * S
    bytes_accessed = (2 * B * S * D * 4
                      + sum(math.prod(a.shape) * a.dtype.itemsize for a in args[1:]))
    cost = pl.CostEstimate(flops=int(flops), transcendentals=int(transcendentals),
                           bytes_accessed=int(bytes_accessed))

    vmem_limit = _vmem_limit_bytes(rows, S, D, dim_ff, ff_chunk, batch_tile,
                                   compute_dtype, args[1:])

    def run(single_buffer_weights):
        x_spec = pl.BlockSpec((batch_tile, S, D), lambda i: (i, 0, 0))

        def resident(shape):
            # Grid-invariant weight/bias blocks: single-buffer so VMEM doesn't hold two copies
            # of every weight (matters at real D/dim_ff, especially v7x's 64 MiB VMEM).
            idx = lambda i: (0,) * len(shape)
            if single_buffer_weights:
                try:
                    return pl.BlockSpec(shape, idx, pipeline_mode=pl.Buffered(1))
                except TypeError:
                    pass
            return pl.BlockSpec(shape, idx)

        grid_spec = pltpu.PrefetchScalarGridSpec(
            num_scalar_prefetch=0,
            grid=(B // batch_tile,),
            in_specs=[x_spec] + [resident(a.shape) for a in args[1:]],
            out_specs=pl.BlockSpec((batch_tile, S, D), lambda i: (i, 0, 0)),
            scratch_shapes=[pltpu.VMEM((batch_tile, S, D), compute_dtype)],
        )
        return pl.pallas_call(
            kernel,
            out_shape=jax.ShapeDtypeStruct((B, S, D), jnp.float32),
            grid_spec=grid_spec,
            compiler_params=pltpu.CompilerParams(
                dimension_semantics=("parallel",),
                vmem_limit_bytes=vmem_limit),
            cost_estimate=cost,
        )(*args)

    try:
        out = run(single_buffer_weights=True)
    except Exception:
        # Fallback if this jax/libtpu build rejects Buffered(1) pipeline_mode at lowering time.
        out = run(single_buffer_weights=False)

    return jnp.transpose(out, (1, 0, 2))                          # back to (S, B, D)


def transformer_block_ref(x, params, num_heads):
    """Pure-JAX reference with identical semantics to the PyTorch module (eval mode)."""
    S, B, D = x.shape
    d_k = D // num_heads
    scale = math.sqrt(d_k)
    hi = jax.lax.Precision.HIGHEST

    def lin(h, w, b):
        return jnp.einsum("sbd,od->sbo", h, w, precision=hi) + b

    Q = lin(x, params["wq"], params["bq"])
    K = lin(x, params["wk"], params["bk"])
    V = lin(x, params["wv"], params["bv"])
    r = lambda t: t.reshape(S, B, num_heads, d_k).transpose(1, 2, 0, 3)
    Q, K, V = r(Q), r(K), r(V)
    scores = jnp.einsum("bhqd,bhkd->bhqk", Q, K, precision=hi) / scale
    attn = jax.nn.softmax(scores, axis=-1)
    ctx = jnp.einsum("bhqk,bhkd->bhqd", attn, V, precision=hi)
    ctx = ctx.transpose(2, 0, 1, 3).reshape(S, B, D)
    a = lin(ctx, params["wo"], params["bo"])

    def ln(h, g, be, eps=1e-5):
        m = jnp.mean(h, axis=-1, keepdims=True)
        v = jnp.mean((h - m) ** 2, axis=-1, keepdims=True)
        return (h - m) / jnp.sqrt(v + eps) * g + be

    x2 = ln(x + a, params["g1"], params["be1"])
    f = jnp.maximum(lin(x2, params["w1"], params["b1"]), 0.0)
    f = lin(f, params["w2"], params["b2"])
    return ln(x2 + f, params["g2"], params["be2"])


def init_params(key, d_model, dim_feedfwd):
    keys = jax.random.split(key, 12)

    def linear(k, out_dim, in_dim):
        bound = 1.0 / math.sqrt(in_dim)
        kw, kb = jax.random.split(k)
        w = jax.random.uniform(kw, (out_dim, in_dim), jnp.float32, -bound, bound)
        b = jax.random.uniform(kb, (out_dim,), jnp.float32, -bound, bound)
        return w, b

    wq, bq = linear(keys[0], d_model, d_model)
    wk, bk = linear(keys[1], d_model, d_model)
    wv, bv = linear(keys[2], d_model, d_model)
    wo, bo = linear(keys[3], d_model, d_model)
    w1, b1 = linear(keys[4], dim_feedfwd, d_model)
    w2, b2 = linear(keys[5], d_model, dim_feedfwd)
    return dict(
        wq=wq, bq=bq, wk=wk, bk=bk, wv=wv, bv=bv, wo=wo, bo=bo,
        g1=jnp.ones((d_model,), jnp.float32), be1=jnp.zeros((d_model,), jnp.float32),
        w1=w1, b1=b1, w2=w2, b2=b2,
        g2=jnp.ones((d_model,), jnp.float32), be2=jnp.zeros((d_model,), jnp.float32),
    )


if __name__ == "__main__":
    S, B, d_model, num_heads, dim_ff = 8, 2, 32, 4, 64
    key = jax.random.PRNGKey(0)
    kx, kp = jax.random.split(key)

    x = jax.random.normal(kx, (S, B, d_model), jnp.float32)
    params = init_params(kp, d_model, dim_ff)

    ref = transformer_block_ref(x, params, num_heads)

    # f32 path, auto batch_tile (1 here -> 2 parallel grid steps, both TCs on v7x).
    out = jax.block_until_ready(transformer_block_pallas(x, params, num_heads))
    assert out.shape == (S, B, d_model)
    err = float(jnp.max(jnp.abs(out - ref)))
    assert jnp.allclose(out, ref, atol=5e-3, rtol=5e-3), err

    # f32 path, full-batch row slab per grid step (fills the MXU M-dim more).
    out2 = jax.block_until_ready(
        transformer_block_pallas(x, params, num_heads, batch_tile=2))
    err2 = float(jnp.max(jnp.abs(out2 - ref)))
    assert jnp.allclose(out2, ref, atol=5e-3, rtol=5e-3), err2

    # bf16 MXU-operand path (f32 accumulation / softmax / LayerNorm) — v6e/v7x throughput.
    out_bf16 = jax.block_until_ready(
        transformer_block_pallas(x, params, num_heads, compute_dtype=jnp.bfloat16))
    assert float(jnp.max(jnp.abs(out_bf16 - ref))) < 0.1

    print("KERNEL_OK")
</pallas_src>

<mosaic_0001>
module attributes {stable_mosaic.version = 11 : i64} {
  func.func @kernel(%arg0: i32, %arg1: memref<1x8x32xf32, #tpu.memory_space<vmem>>, %arg2: memref<32x32xf32, #tpu.memory_space<vmem>>, %arg3: memref<1x32xf32, #tpu.memory_space<vmem>>, %arg4: memref<32x32xf32, #tpu.memory_space<vmem>>, %arg5: memref<1x32xf32, #tpu.memory_space<vmem>>, %arg6: memref<32x32xf32, #tpu.memory_space<vmem>>, %arg7: memref<1x32xf32, #tpu.memory_space<vmem>>, %arg8: memref<32x32xf32, #tpu.memory_space<vmem>>, %arg9: memref<1x32xf32, #tpu.memory_space<vmem>>, %arg10: memref<1x32xf32, #tpu.memory_space<vmem>>, %arg11: memref<1x32xf32, #tpu.memory_space<vmem>>, %arg12: memref<64x32xf32, #tpu.memory_space<vmem>>, %arg13: memref<1x64xf32, #tpu.memory_space<vmem>>, %arg14: memref<32x64xf32, #tpu.memory_space<vmem>>, %arg15: memref<1x32xf32, #tpu.memory_space<vmem>>, %arg16: memref<1x32xf32, #tpu.memory_space<vmem>>, %arg17: memref<1x32xf32, #tpu.memory_space<vmem>>, %arg18: memref<1x8x32xf32, #tpu.memory_space<vmem>>, %arg19: memref<1x8x32xf32, #tpu.memory_space<vmem>>) attributes {dimension_semantics = [#tpu.dimension_semantics<parallel>], iteration_bounds = array<i64: 2>, scalar_prefetch = 0 : i64, scratch_operands = 1 : i64, tpu.core_type = #tpu.core_type<tc>, window_params = [{transform_indices = @transform_0, window_bounds = array<i64: 1, 8, 32>}, {pipeline_mode = #tpu.pipeline_mode<synchronous>, transform_indices = @transform_1, window_bounds = array<i64: 32, 32>}, {pipeline_mode = #tpu.pipeline_mode<synchronous>, transform_indices = @transform_2, window_bounds = array<i64: 1, 32>}, {pipeline_mode = #tpu.pipeline_mode<synchronous>, transform_indices = @transform_3, window_bounds = array<i64: 32, 32>}, {pipeline_mode = #tpu.pipeline_mode<synchronous>, transform_indices = @transform_4, window_bounds = array<i64: 1, 32>}, {pipeline_mode = #tpu.pipeline_mode<synchronous>, transform_indices = @transform_5, window_bounds = array<i64: 32, 32>}, {pipeline_mode = #tpu.pipeline_mode<synchronous>, transform_indices = @transform_6, window_bounds = array<i64: 1, 32>}, {pipeline_mode = #tpu.pipeline_mode<synchronous>, transform_indices = @transform_7, window_bounds = array<i64: 32, 32>}, {pipeline_mode = #tpu.pipeline_mode<synchronous>, transform_indices = @transform_8, window_bounds = array<i64: 1, 32>}, {pipeline_mode = #tpu.pipeline_mode<synchronous>, transform_indices = @transform_9, window_bounds = array<i64: 1, 32>}, {pipeline_mode = #tpu.pipeline_mode<synchronous>, transform_indices = @transform_10, window_bounds = array<i64: 1, 32>}, {pipeline_mode = #tpu.pipeline_mode<synchronous>, transform_indices = @transform_11, window_bounds = array<i64: 64, 32>}, {pipeline_mode = #tpu.pipeline_mode<synchronous>, transform_indices = @transform_12, window_bounds = array<i64: 1, 64>}, {pipeline_mode = #tpu.pipeline_mode<synchronous>, transform_indices = @transform_13, window_bounds = array<i64: 32, 64>}, {pipeline_mode = #tpu.pipeline_mode<synchronous>, transform_indices = @transform_14, window_bounds = array<i64: 1, 32>}, {pipeline_mode = #tpu.pipeline_mode<synchronous>, transform_indices = @transform_15, window_bounds = array<i64: 1, 32>}, {pipeline_mode = #tpu.pipeline_mode<synchronous>, transform_indices = @transform_16, window_bounds = array<i64: 1, 32>}, {transform_indices = @transform_17, window_bounds = array<i64: 1, 8, 32>}]} {
    %c0 = arith.constant 0 : index
    %c0_0 = arith.constant 0 : index
    %c0_1 = arith.constant 0 : index
    %0 = vector.load %arg1[%c0, %c0_0, %c0_1] : memref<1x8x32xf32, #tpu.memory_space<vmem>>, vector<1x8x32xf32>
    %1 = vector.shape_cast %0 : vector<1x8x32xf32> to vector<8x32xf32>
    %c0_2 = arith.constant 0 : index
    %c0_3 = arith.constant 0 : index
    %2 = vector.load %arg2[%c0_2, %c0_3] : memref<32x32xf32, #tpu.memory_space<vmem>>, vector<32x32xf32>
    %c0_4 = arith.constant 0 : index
    %c0_5 = arith.constant 0 : index
    %3 = vector.load %arg3[%c0_4, %c0_5] : memref<1x32xf32, #tpu.memory_space<vmem>>, vector<1x32xf32>
    %cst = arith.constant dense<0.000000e+00> : vector<8x32xf32>
    %4 = tpu.matmul %1, %2, %cst {dimension_numbers = #tpu.dot_dimension_numbers<[1], [1], [0], [0], [0, 0, 1, 0], [], []>} : vector<8x32xf32>, vector<32x32xf32>, vector<8x32xf32> -> vector<8x32xf32>
    %5 = vector.broadcast %3 : vector<1x32xf32> to vector<8x32xf32>
    %6 = arith.addf %4, %5 : vector<8x32xf32>
    %c0_6 = arith.constant 0 : index
    %c0_7 = arith.constant 0 : index
    %7 = vector.load %arg4[%c0_6, %c0_7] : memref<32x32xf32, #tpu.memory_space<vmem>>, vector<32x32xf32>
    %c0_8 = arith.constant 0 : index
    %c0_9 = arith.constant 0 : index
    %8 = vector.load %arg5[%c0_8, %c0_9] : memref<1x32xf32, #tpu.memory_space<vmem>>, vector<1x32xf32>
    %cst_10 = arith.constant dense<0.000000e+00> : vector<8x32xf32>
    %9 = tpu.matmul %1, %7, %cst_10 {dimension_numbers = #tpu.dot_dimension_numbers<[1], [1], [0], [0], [0, 0, 1, 0], [], []>} : vector<8x32xf32>, vector<32x32xf32>, vector<8x32xf32> -> vector<8x32xf32>
    %10 = vector.broadcast %8 : vector<1x32xf32> to vector<8x32xf32>
    %11 = arith.addf %9, %10 : vector<8x32xf32>
    %c0_11 = arith.constant 0 : index
    %c0_12 = arith.constant 0 : index
    %12 = vector.load %arg6[%c0_11, %c0_12] : memref<32x32xf32, #tpu.memory_space<vmem>>, vector<32x32xf32>
    %c0_13 = arith.constant 0 : index
    %c0_14 = arith.constant 0 : index
    %13 = vector.load %arg7[%c0_13, %c0_14] : memref<1x32xf32, #tpu.memory_space<vmem>>, vector<1x32xf32>
    %cst_15 = arith.constant dense<0.000000e+00> : vector<8x32xf32>
    %14 = tpu.matmul %1, %12, %cst_15 {dimension_numbers = #tpu.dot_dimension_numbers<[1], [1], [0], [0], [0, 0, 1, 0], [], []>} : vector<8x32xf32>, vector<32x32xf32>, vector<8x32xf32> -> vector<8x32xf32>
    %15 = vector.broadcast %13 : vector<1x32xf32> to vector<8x32xf32>
    %16 = arith.addf %14, %15 : vector<8x32xf32>
    %cst_16 = arith.constant 0.353553385 : f32
    %17 = vector.broadcast %cst_16 : f32 to vector<8x32xf32>
    %18 = arith.mulf %6, %17 : vector<8x32xf32>
    %19 = vector.shape_cast %18 : vector<8x32xf32> to vector<1x8x32xf32>
    %20 = vector.shape_cast %11 : vector<8x32xf32> to vector<1x8x32xf32>
    %21 = vector.shape_cast %16 : vector<8x32xf32> to vector<1x8x32xf32>
    %22 = vector.extract_strided_slice %19 {offsets = [0, 0, 0], sizes = [1, 8, 8], strides = [1, 1, 1]} : vector<1x8x32xf32> to vector<1x8x8xf32>
    %23 = vector.extract_strided_slice %20 {offsets = [0, 0, 0], sizes = [1, 8, 8], strides = [1, 1, 1]} : vector<1x8x32xf32> to vector<1x8x8xf32>
    %24 = vector.extract_strided_slice %21 {offsets = [0, 0, 0], sizes = [1, 8, 8], strides = [1, 1, 1]} : vector<1x8x32xf32> to vector<1x8x8xf32>
    "tpu.trace_start"() <{level = 10 : i32, message = "bqd,bkd->bqk"}> : () -> ()
    %cst_17 = arith.constant dense<0.000000e+00> : vector<1x8x8xf32>
    %25 = tpu.matmul %22, %23, %cst_17 {dimension_numbers = #tpu.dot_dimension_numbers<[2], [2], [1], [1], [0, 0, 0, 1, 1, 1], [0], [0]>} : vector<1x8x8xf32>, vector<1x8x8xf32>, vector<1x8x8xf32> -> vector<1x8x8xf32>
    "tpu.trace_stop"() : () -> ()
    %cst_18 = arith.constant dense<0xFF800000> : vector<1x8xf32>
    %26 = vector.multi_reduction <maximumf>, %25, %cst_18 [2] : vector<1x8x8xf32> to vector<1x8xf32>
    %27 = vector.shape_cast %26 : vector<1x8xf32> to vector<1x8x1xf32>
    %28 = vector.broadcast %27 : vector<1x8x1xf32> to vector<1x8x8xf32>
    %29 = arith.subf %25, %28 : vector<1x8x8xf32>
    %30 = math.exp %29 : vector<1x8x8xf32>
    %cst_19 = arith.constant dense<0.000000e+00> : vector<1x8xf32>
    %31 = vector.multi_reduction <add>, %30, %cst_19 [2] : vector<1x8x8xf32> to vector<1x8xf32>
    %32 = vector.shape_cast %31 : vector<1x8xf32> to vector<1x8x1xf32>
    %33 = tpu.reciprocal %32 {approx = true} : vector<1x8x1xf32> -> vector<1x8x1xf32>
    "tpu.trace_start"() <{level = 10 : i32, message = "bqk,bkd->bqd"}> : () -> ()
    %cst_20 = arith.constant dense<0.000000e+00> : vector<1x8x8xf32>
    %34 = tpu.matmul %30, %24, %cst_20 {dimension_numbers = #tpu.dot_dimension_numbers<[2], [1], [1], [2], [0, 0, 0, 1, 1, 2], [0], [0]>} : vector<1x8x8xf32>, vector<1x8x8xf32>, vector<1x8x8xf32> -> vector<1x8x8xf32>
    "tpu.trace_stop"() : () -> ()
    %35 = vector.broadcast %33 : vector<1x8x1xf32> to vector<1x8x8xf32>
    %36 = arith.mulf %34, %35 : vector<1x8x8xf32>
    %c0_21 = arith.constant 0 : index
    %c0_22 = arith.constant 0 : index
    %c0_23 = arith.constant 0 : index
    %37 = vector.load %arg19[%c0_21, %c0_22, %c0_23] : memref<1x8x32xf32, #tpu.memory_space<vmem>>, vector<1x8x8xf32>
    tpu.vector_store %arg19[%c0_21, %c0_22, %c0_23], %36 {strides = array<i32>} : memref<1x8x32xf32, #tpu.memory_space<vmem>>, vector<1x8x8xf32>,
    %38 = vector.extract_strided_slice %19 {offsets = [0, 0, 8], sizes = [1, 8, 8], strides = [1, 1, 1]} : vector<1x8x32xf32> to vector<1x8x8xf32>
    %39 = vector.extract_strided_slice %20 {offsets = [0, 0, 8], sizes = [1, 8, 8], strides = [1, 1, 1]} : vector<1x8x32xf32> to vector<1x8x8xf32>
    %40 = vector.extract_strided_slice %21 {offsets = [0, 0, 8], sizes = [1, 8, 8], strides = [1, 1, 1]} : vector<1x8x32xf32> to vector<1x8x8xf32>
    "tpu.trace_start"() <{level = 10 : i32, message = "bqd,bkd->bqk"}> : () -> ()
    %cst_24 = arith.constant dense<0.000000e+00> : vector<1x8x8xf32>
    %41 = tpu.matmul %38, %39, %cst_24 {dimension_numbers = #tpu.dot_dimension_numbers<[2], [2], [1], [1], [0, 0, 0, 1, 1, 1], [0], [0]>} : vector<1x8x8xf32>, vector<1x8x8xf32>, vector<1x8x8xf32> -> vector<1x8x8xf32>
    "tpu.trace_stop"() : () -> ()
    %cst_25 = arith.constant dense<0xFF800000> : vector<1x8xf32>
    %42 = vector.multi_reduction <maximumf>, %41, %cst_25 [2] : vector<1x8x8xf32> to vector<1x8xf32>
    %43 = vector.shape_cast %42 : vector<1x8xf32> to vector<1x8x1xf32>
    %44 = vector.broadcast %43 : vector<1x8x1xf32> to vector<1x8x8xf32>
    %45 = arith.subf %41, %44 : vector<1x8x8xf32>
    %46 = math.exp %45 : vector<1x8x8xf32>
    %cst_26 = arith.constant dense<0.000000e+00> : vector<1x8xf32>
    %47 = vector.multi_reduction <add>, %46, %cst_26 [2] : vector<1x8x8xf32> to vector<1x8xf32>
    %48 = vector.shape_cast %47 : vector<1x8xf32> to vector<1x8x1xf32>
    %49 = tpu.reciprocal %48 {approx = true} : vector<1x8x1xf32> -> vector<1x8x1xf32>
    "tpu.trace_start"() <{level = 10 : i32, message = "bqk,bkd->bqd"}> : () -> ()
    %cst_27 = arith.constant dense<0.000000e+00> : vector<1x8x8xf32>
    %50 = tpu.matmul %46, %40, %cst_27 {dimension_numbers = #tpu.dot_dimension_numbers<[2], [1], [1], [2], [0, 0, 0, 1, 1, 2], [0], [0]>} : vector<1x8x8xf32>, vector<1x8x8xf32>, vector<1x8x8xf32> -> vector<1x8x8xf32>
    "tpu.trace_stop"() : () -> ()
    %51 = vector.broadcast %49 : vector<1x8x1xf32> to vector<1x8x8xf32>
    %52 = arith.mulf %50, %51 : vector<1x8x8xf32>
    %c0_28 = arith.constant 0 : index
    %c0_29 = arith.constant 0 : index
    %c8 = arith.constant 8 : index
    %53 = vector.load %arg19[%c0_28, %c0_29, %c8] : memref<1x8x32xf32, #tpu.memory_space<vmem>>, vector<1x8x8xf32>
    tpu.vector_store %arg19[%c0_28, %c0_29, %c8], %52 {strides = array<i32>} : memref<1x8x32xf32, #tpu.memory_space<vmem>>, vector<1x8x8xf32>,
    %54 = vector.extract_strided_slice %19 {offsets = [0, 0, 16], sizes = [1, 8, 8], strides = [1, 1, 1]} : vector<1x8x32xf32> to vector<1x8x8xf32>
    %55 = vector.extract_strided_slice %20 {offsets = [0, 0, 16], sizes = [1, 8, 8], strides = [1, 1, 1]} : vector<1x8x32xf32> to vector<1x8x8xf32>
    %56 = vector.extract_strided_slice %21 {offsets = [0, 0, 16], sizes = [1, 8, 8], strides = [1, 1, 1]} : vector<1x8x32xf32> to vector<1x8x8xf32>
    "tpu.trace_start"() <{level = 10 : i32, message = "bqd,bkd->bqk"}> : () -> ()
    %cst_30 = arith.constant dense<0.000000e+00> : vector<1x8x8xf32>
    %57 = tpu.matmul %54, %55, %cst_30 {dimension_numbers = #tpu.dot_dimension_numbers<[2], [2], [1], [1], [0, 0, 0, 1, 1, 1], [0], [0]>} : vector<1x8x8xf32>, vector<1x8x8xf32>, vector<1x8x8xf32> -> vector<1x8x8xf32>
    "tpu.trace_stop"() : () -> ()
    %cst_31 = arith.constant dense<0xFF800000> : vector<1x8xf32>
    %58 = vector.multi_reduction <maximumf>, %57, %cst_31 [2] : vector<1x8x8xf32> to vector<1x8xf32>
    %59 = vector.shape_cast %58 : vector<1x8xf32> to vector<1x8x1xf32>
    %60 = vector.broadcast %59 : vector<1x8x1xf32> to vector<1x8x8xf32>
    %61 = arith.subf %57, %60 : vector<1x8x8xf32>
    %62 = math.exp %61 : vector<1x8x8xf32>
    %cst_32 = arith.constant dense<0.000000e+00> : vector<1x8xf32>
    %63 = vector.multi_reduction <add>, %62, %cst_32 [2] : vector<1x8x8xf32> to vector<1x8xf32>
    %64 = vector.shape_cast %63 : vector<1x8xf32> to vector<1x8x1xf32>
    %65 = tpu.reciprocal %64 {approx = true} : vector<1x8x1xf32> -> vector<1x8x1xf32>
    "tpu.trace_start"() <{level = 10 : i32, message = "bqk,bkd->bqd"}> : () -> ()
    %cst_33 = arith.constant dense<0.000000e+00> : vector<1x8x8xf32>
    %66 = tpu.matmul %62, %56, %cst_33 {dimension_numbers = #tpu.dot_dimension_numbers<[2], [1], [1], [2], [0, 0, 0, 1, 1, 2], [0], [0]>} : vector<1x8x8xf32>, vector<1x8x8xf32>, vector<1x8x8xf32> -> vector<1x8x8xf32>
    "tpu.trace_stop"() : () -> ()
    %67 = vector.broadcast %65 : vector<1x8x1xf32> to vector<1x8x8xf32>
    %68 = arith.mulf %66, %67 : vector<1x8x8xf32>
    %c0_34 = arith.constant 0 : index
    %c0_35 = arith.constant 0 : index
    %c16 = arith.constant 16 : index
    %69 = vector.load %arg19[%c0_34, %c0_35, %c16] : memref<1x8x32xf32, #tpu.memory_space<vmem>>, vector<1x8x8xf32>
    tpu.vector_store %arg19[%c0_34, %c0_35, %c16], %68 {strides = array<i32>} : memref<1x8x32xf32, #tpu.memory_space<vmem>>, vector<1x8x8xf32>,
    %70 = vector.extract_strided_slice %19 {offsets = [0, 0, 24], sizes = [1, 8, 8], strides = [1, 1, 1]} : vector<1x8x32xf32> to vector<1x8x8xf32>
    %71 = vector.extract_strided_slice %20 {offsets = [0, 0, 24], sizes = [1, 8, 8], strides = [1, 1, 1]} : vector<1x8x32xf32> to vector<1x8x8xf32>
    %72 = vector.extract_strided_slice %21 {offsets = [0, 0, 24], sizes = [1, 8, 8], strides = [1, 1, 1]} : vector<1x8x32xf32> to vector<1x8x8xf32>
    "tpu.trace_start"() <{level = 10 : i32, message = "bqd,bkd->bqk"}> : () -> ()
    %cst_36 = arith.constant dense<0.000000e+00> : vector<1x8x8xf32>
    %73 = tpu.matmul %70, %71, %cst_36 {dimension_numbers = #tpu.dot_dimension_numbers<[2], [2], [1], [1], [0, 0, 0, 1, 1, 1], [0], [0]>} : vector<1x8x8xf32>, vector<1x8x8xf32>, vector<1x8x8xf32> -> vector<1x8x8xf32>
    "tpu.trace_stop"() : () -> ()
    %cst_37 = arith.constant dense<0xFF800000> : vector<1x8xf32>
    %74 = vector.multi_reduction <maximumf>, %73, %cst_37 [2] : vector<1x8x8xf32> to vector<1x8xf32>
    %75 = vector.shape_cast %74 : vector<1x8xf32> to vector<1x8x1xf32>
    %76 = vector.broadcast %75 : vector<1x8x1xf32> to vector<1x8x8xf32>
    %77 = arith.subf %73, %76 : vector<1x8x8xf32>
    %78 = math.exp %77 : vector<1x8x8xf32>
    %cst_38 = arith.constant dense<0.000000e+00> : vector<1x8xf32>
    %79 = vector.multi_reduction <add>, %78, %cst_38 [2] : vector<1x8x8xf32> to vector<1x8xf32>
    %80 = vector.shape_cast %79 : vector<1x8xf32> to vector<1x8x1xf32>
    %81 = tpu.reciprocal %80 {approx = true} : vector<1x8x1xf32> -> vector<1x8x1xf32>
    "tpu.trace_start"() <{level = 10 : i32, message = "bqk,bkd->bqd"}> : () -> ()
    %cst_39 = arith.constant dense<0.000000e+00> : vector<1x8x8xf32>
    %82 = tpu.matmul %78, %72, %cst_39 {dimension_numbers = #tpu.dot_dimension_numbers<[2], [1], [1], [2], [0, 0, 0, 1, 1, 2], [0], [0]>} : vector<1x8x8xf32>, vector<1x8x8xf32>, vector<1x8x8xf32> -> vector<1x8x8xf32>
    "tpu.trace_stop"() : () -> ()
    %83 = vector.broadcast %81 : vector<1x8x1xf32> to vector<1x8x8xf32>
    %84 = arith.mulf %82, %83 : vector<1x8x8xf32>
    %c0_40 = arith.constant 0 : index
    %c0_41 = arith.constant 0 : index
    %c24 = arith.constant 24 : index
    %85 = vector.load %arg19[%c0_40, %c0_41, %c24] : memref<1x8x32xf32, #tpu.memory_space<vmem>>, vector<1x8x8xf32>
    tpu.vector_store %arg19[%c0_40, %c0_41, %c24], %84 {strides = array<i32>} : memref<1x8x32xf32, #tpu.memory_space<vmem>>, vector<1x8x8xf32>,
    %c0_42 = arith.constant 0 : index
    %c0_43 = arith.constant 0 : index
    %c0_44 = arith.constant 0 : index
    %86 = vector.load %arg19[%c0_42, %c0_43, %c0_44] : memref<1x8x32xf32, #tpu.memory_space<vmem>>, vector<1x8x32xf32>
    %87 = vector.shape_cast %86 : vector<1x8x32xf32> to vector<8x32xf32>
    %c0_45 = arith.constant 0 : index
    %c0_46 = arith.constant 0 : index
    %88 = vector.load %arg8[%c0_45, %c0_46] : memref<32x32xf32, #tpu.memory_space<vmem>>, vector<32x32xf32>
    %c0_47 = arith.constant 0 : index
    %c0_48 = arith.constant 0 : index
    %89 = vector.load %arg9[%c0_47, %c0_48] : memref<1x32xf32, #tpu.memory_space<vmem>>, vector<1x32xf32>
    %cst_49 = arith.constant dense<0.000000e+00> : vector<8x32xf32>
    %90 = tpu.matmul %87, %88, %cst_49 {dimension_numbers = #tpu.dot_dimension_numbers<[1], [1], [0], [0], [0, 0, 1, 0], [], []>} : vector<8x32xf32>, vector<32x32xf32>, vector<8x32xf32> -> vector<8x32xf32>
    %91 = vector.broadcast %89 : vector<1x32xf32> to vector<8x32xf32>
    %92 = arith.addf %90, %91 : vector<8x32xf32>
    %c0_50 = arith.constant 0 : index
    %c0_51 = arith.constant 0 : index
    %c0_52 = arith.constant 0 : index
    %93 = vector.load %arg1[%c0_50, %c0_51, %c0_52] : memref<1x8x32xf32, #tpu.memory_space<vmem>>, vector<1x8x32xf32>
    %94 = vector.shape_cast %93 : vector<1x8x32xf32> to vector<8x32xf32>
    %95 = arith.addf %94, %92 : vector<8x32xf32>
    %c0_53 = arith.constant 0 : index
    %c0_54 = arith.constant 0 : index
    %96 = vector.load %arg10[%c0_53, %c0_54] : memref<1x32xf32, #tpu.memory_space<vmem>>, vector<1x32xf32>
    %c0_55 = arith.constant 0 : index
    %c0_56 = arith.constant 0 : index
    %97 = vector.load %arg11[%c0_55, %c0_56] : memref<1x32xf32, #tpu.memory_space<vmem>>, vector<1x32xf32>
    %cst_57 = arith.constant dense<0.000000e+00> : vector<8xf32>
    %98 = vector.multi_reduction <add>, %95, %cst_57 [1] : vector<8x32xf32> to vector<8xf32>
    %99 = vector.shape_cast %98 : vector<8xf32> to vector<8x1xf32>
    %cst_58 = arith.constant 3.200000e+01 : f32
    %100 = vector.broadcast %cst_58 : f32 to vector<8x1xf32>
    %101 = arith.divf %99, %100 : vector<8x1xf32>
    %102 = arith.mulf %95, %95 : vector<8x32xf32>
    %cst_59 = arith.constant dense<0.000000e+00> : vector<8xf32>
    %103 = vector.multi_reduction <add>, %102, %cst_59 [1] : vector<8x32xf32> to vector<8xf32>
    %104 = vector.shape_cast %103 : vector<8xf32> to vector<8x1xf32>
    %cst_60 = arith.constant 3.200000e+01 : f32
    %105 = vector.broadcast %cst_60 : f32 to vector<8x1xf32>
    %106 = arith.divf %104, %105 : vector<8x1xf32>
    %107 = arith.mulf %101, %101 : vector<8x1xf32>
    %108 = arith.subf %106, %107 : vector<8x1xf32>
    %109 = vector.broadcast %101 : vector<8x1xf32> to vector<8x32xf32>
    %110 = arith.subf %95, %109 : vector<8x32xf32>
    %cst_61 = arith.constant 9.99999974E-6 : f32
    %111 = vector.broadcast %cst_61 : f32 to vector<8x1xf32>
    %112 = arith.addf %108, %111 : vector<8x1xf32>
    %113 = math.rsqrt %112 : vector<8x1xf32>
    %114 = vector.broadcast %113 : vector<8x1xf32> to vector<8x32xf32>
    %115 = arith.mulf %110, %114 : vector<8x32xf32>
    %116 = vector.broadcast %96 : vector<1x32xf32> to vector<8x32xf32>
    %117 = arith.mulf %115, %116 : vector<8x32xf32>
    %118 = vector.broadcast %97 : vector<1x32xf32> to vector<8x32xf32>
    %119 = arith.addf %117, %118 : vector<8x32xf32>
    %cst_62 = arith.constant 0.000000e+00 : f32
    %120 = vector.broadcast %cst_62 : f32 to vector<8x32xf32>
    %c0_63 = arith.constant 0 : index
    %c0_64 = arith.constant 0 : index
    %121 = vector.load %arg12[%c0_63, %c0_64] : memref<64x32xf32, #tpu.memory_space<vmem>>, vector<64x32xf32>
    %cst_65 = arith.constant dense<0.000000e+00> : vector<8x64xf32>
    %122 = tpu.matmul %119, %121, %cst_65 {dimension_numbers = #tpu.dot_dimension_numbers<[1], [1], [0], [0], [0, 0, 1, 0], [], []>} : vector<8x32xf32>, vector<64x32xf32>, vector<8x64xf32> -> vector<8x64xf32>
    %c0_66 = arith.constant 0 : index
    %c0_67 = arith.constant 0 : index
    %123 = vector.load %arg13[%c0_66, %c0_67] : memref<1x64xf32, #tpu.memory_space<vmem>>, vector<1x64xf32>
    %124 = vector.broadcast %123 : vector<1x64xf32> to vector<8x64xf32>
    %125 = arith.addf %122, %124 : vector<8x64xf32>
    %cst_68 = arith.constant 0.000000e+00 : f32
    %126 = vector.broadcast %cst_68 : f32 to vector<8x64xf32>
    %127 = arith.maximumf %125, %126 : vector<8x64xf32>
    %c0_69 = arith.constant 0 : index
    %c0_70 = arith.constant 0 : index
    %128 = vector.load %arg14[%c0_69, %c0_70] : memref<32x64xf32, #tpu.memory_space<vmem>>, vector<32x64xf32>
    %cst_71 = arith.constant dense<0.000000e+00> : vector<8x32xf32>
    %129 = tpu.matmul %127, %128, %cst_71 {dimension_numbers = #tpu.dot_dimension_numbers<[1], [1], [0], [0], [0, 0, 1, 0], [], []>} : vector<8x64xf32>, vector<32x64xf32>, vector<8x32xf32> -> vector<8x32xf32>
    %130 = arith.addf %120, %129 : vector<8x32xf32>
    %c0_72 = arith.constant 0 : index
    %c0_73 = arith.constant 0 : index
    %131 = vector.load %arg15[%c0_72, %c0_73] : memref<1x32xf32, #tpu.memory_space<vmem>>, vector<1x32xf32>
    %132 = vector.broadcast %131 : vector<1x32xf32> to vector<8x32xf32>
    %133 = arith.addf %130, %132 : vector<8x32xf32>
    %134 = arith.addf %119, %133 : vector<8x32xf32>
    %c0_74 = arith.constant 0 : index
    %c0_75 = arith.constant 0 : index
    %135 = vector.load %arg16[%c0_74, %c0_75] : memref<1x32xf32, #tpu.memory_space<vmem>>, vector<1x32xf32>
    %c0_76 = arith.constant 0 : index
    %c0_77 = arith.constant 0 : index
    %136 = vector.load %arg17[%c0_76, %c0_77] : memref<1x32xf32, #tpu.memory_space<vmem>>, vector<1x32xf32>
    %cst_78 = arith.constant dense<0.000000e+00> : vector<8xf32>
    %137 = vector.multi_reduction <add>, %134, %cst_78 [1] : vector<8x32xf32> to vector<8xf32>
    %138 = vector.shape_cast %137 : vector<8xf32> to vector<8x1xf32>
    %cst_79 = arith.constant 3.200000e+01 : f32
    %139 = vector.broadcast %cst_79 : f32 to vector<8x1xf32>
    %140 = arith.divf %138, %139 : vector<8x1xf32>
    %141 = arith.mulf %134, %134 : vector<8x32xf32>
    %cst_80 = arith.constant dense<0.000000e+00> : vector<8xf32>
    %142 = vector.multi_reduction <add>, %141, %cst_80 [1] : vector<8x32xf32> to vector<8xf32>
    %143 = vector.shape_cast %142 : vector<8xf32> to vector<8x1xf32>
    %cst_81 = arith.constant 3.200000e+01 : f32
    %144 = vector.broadcast %cst_81 : f32 to vector<8x1xf32>
    %145 = arith.divf %143, %144 : vector<8x1xf32>
    %146 = arith.mulf %140, %140 : vector<8x1xf32>
    %147 = arith.subf %145, %146 : vector<8x1xf32>
    %148 = vector.broadcast %140 : vector<8x1xf32> to vector<8x32xf32>
    %149 = arith.subf %134, %148 : vector<8x32xf32>
    %cst_82 = arith.constant 9.99999974E-6 : f32
    %150 = vector.broadcast %cst_82 : f32 to vector<8x1xf32>
    %151 = arith.addf %147, %150 : vector<8x1xf32>
    %152 = math.rsqrt %151 : vector<8x1xf32>
    %153 = vector.broadcast %152 : vector<8x1xf32> to vector<8x32xf32>
    %154 = arith.mulf %149, %153 : vector<8x32xf32>
    %155 = vector.broadcast %135 : vector<1x32xf32> to vector<8x32xf32>
    %156 = arith.mulf %154, %155 : vector<8x32xf32>
    %157 = vector.broadcast %136 : vector<1x32xf32> to vector<8x32xf32>
    %158 = arith.addf %156, %157 : vector<8x32xf32>
    %159 = vector.shape_cast %158 : vector<8x32xf32> to vector<1x8x32xf32>
    %c0_83 = arith.constant 0 : index
    %c0_84 = arith.constant 0 : index
    %c0_85 = arith.constant 0 : index
    %160 = vector.load %arg18[%c0_83, %c0_84, %c0_85] : memref<1x8x32xf32, #tpu.memory_space<vmem>>, vector<1x8x32xf32>
    tpu.vector_store %arg18[%c0_83, %c0_84, %c0_85], %159 {strides = array<i32>} : memref<1x8x32xf32, #tpu.memory_space<vmem>>, vector<1x8x32xf32>,
    return
  }
  func.func @transform_0(%arg0: i32) -> (i32, i32, i32) {
    %c0_i32 = arith.constant 0 : i32
    %c0_i32_0 = arith.constant 0 : i32
    %c0_i32_1 = arith.constant 0 : i32
    return %arg0, %c0_i32, %c0_i32_0 : i32, i32, i32
  }
  func.func @transform_1(%arg0: i32) -> (i32, i32) {
    %c0_i32 = arith.constant 0 : i32
    %c0_i32_0 = arith.constant 0 : i32
    %c0_i32_1 = arith.constant 0 : i32
    return %c0_i32, %c0_i32_0 : i32, i32
  }
  func.func @transform_2(%arg0: i32) -> (i32, i32) {
    %c0_i32 = arith.constant 0 : i32
    %c0_i32_0 = arith.constant 0 : i32
    %c0_i32_1 = arith.constant 0 : i32
    return %c0_i32, %c0_i32_0 : i32, i32
  }
  func.func @transform_3(%arg0: i32) -> (i32, i32) {
    %c0_i32 = arith.constant 0 : i32
    %c0_i32_0 = arith.constant 0 : i32
    %c0_i32_1 = arith.constant 0 : i32
    return %c0_i32, %c0_i32_0 : i32, i32
  }
  func.func @transform_4(%arg0: i32) -> (i32, i32) {
    %c0_i32 = arith.constant 0 : i32
    %c0_i32_0 = arith.constant 0 : i32
    %c0_i32_1 = arith.constant 0 : i32
    return %c0_i32, %c0_i32_0 : i32, i32
  }
  func.func @transform_5(%arg0: i32) -> (i32, i32) {
    %c0_i32 = arith.constant 0 : i32
    %c0_i32_0 = arith.constant 0 : i32
    %c0_i32_1 = arith.constant 0 : i32
    return %c0_i32, %c0_i32_0 : i32, i32
  }
  func.func @transform_6(%arg0: i32) -> (i32, i32) {
    %c0_i32 = arith.constant 0 : i32
    %c0_i32_0 = arith.constant 0 : i32
    %c0_i32_1 = arith.constant 0 : i32
    return %c0_i32, %c0_i32_0 : i32, i32
  }
  func.func @transform_7(%arg0: i32) -> (i32, i32) {
    %c0_i32 = arith.constant 0 : i32
    %c0_i32_0 = arith.constant 0 : i32
    %c0_i32_1 = arith.constant 0 : i32
    return %c0_i32, %c0_i32_0 : i32, i32
  }
  func.func @transform_8(%arg0: i32) -> (i32, i32) {
    %c0_i32 = arith.constant 0 : i32
    %c0_i32_0 = arith.constant 0 : i32
    %c0_i32_1 = arith.constant 0 : i32
    return %c0_i32, %c0_i32_0 : i32, i32
  }
  func.func @transform_9(%arg0: i32) -> (i32, i32) {
    %c0_i32 = arith.constant 0 : i32
    %c0_i32_0 = arith.constant 0 : i32
    %c0_i32_1 = arith.constant 0 : i32
    return %c0_i32, %c0_i32_0 : i32, i32
  }
  func.func @transform_10(%arg0: i32) -> (i32, i32) {
    %c0_i32 = arith.constant 0 : i32
    %c0_i32_0 = arith.constant 0 : i32
    %c0_i32_1 = arith.constant 0 : i32
    return %c0_i32, %c0_i32_0 : i32, i32
  }
  func.func @transform_11(%arg0: i32) -> (i32, i32) {
    %c0_i32 = arith.constant 0 : i32
    %c0_i32_0 = arith.constant 0 : i32
    %c0_i32_1 = arith.constant 0 : i32
    return %c0_i32, %c0_i32_0 : i32, i32
  }
  func.func @transform_12(%arg0: i32) -> (i32, i32) {
    %c0_i32 = arith.constant 0 : i32
    %c0_i32_0 = arith.constant 0 : i32
    %c0_i32_1 = arith.constant 0 : i32
    return %c0_i32, %c0_i32_0 : i32, i32
  }
  func.func @transform_13(%arg0: i32) -> (i32, i32) {
    %c0_i32 = arith.constant 0 : i32
    %c0_i32_0 = arith.constant 0 : i32
    %c0_i32_1 = arith.constant 0 : i32
    return %c0_i32, %c0_i32_0 : i32, i32
  }
  func.func @transform_14(%arg0: i32) -> (i32, i32) {
    %c0_i32 = arith.constant 0 : i32
    %c0_i32_0 = arith.constant 0 : i32
    %c0_i32_1 = arith.constant 0 : i32
    return %c0_i32, %c0_i32_0 : i32, i32
  }
  func.func @transform_15(%arg0: i32) -> (i32, i32) {
    %c0_i32 = arith.constant 0 : i32
    %c0_i32_0 = arith.constant 0 : i32
    %c0_i32_1 = arith.constant 0 : i32
    return %c0_i32, %c0_i32_0 : i32, i32
  }
  func.func @transform_16(%arg0: i32) -> (i32, i32) {
    %c0_i32 = arith.constant 0 : i32
    %c0_i32_0 = arith.constant 0 : i32
    %c0_i32_1 = arith.constant 0 : i32
    return %c0_i32, %c0_i32_0 : i32, i32
  }
  func.func @transform_17(%arg0: i32) -> (i32, i32, i32) {
    %c0_i32 = arith.constant 0 : i32
    %c0_i32_0 = arith.constant 0 : i32
    %c0_i32_1 = arith.constant 0 : i32
    return %arg0, %c0_i32, %c0_i32_0 : i32, i32, i32
  }
}

module attributes {stable_mosaic.version = 11 : i64} {
  func.func @kernel(%arg0: i32, %arg1: memref<1x8x32xf32, #tpu.memory_space<vmem>>, %arg2: memref<32x32xf32, #tpu.memory_space<vmem>>, %arg3: memref<1x32xf32, #tpu.memory_space<vmem>>, %arg4: memref<32x32xf32, #tpu.memory_space<vmem>>, %arg5: memref<1x32xf32, #tpu.memory_space<vmem>>, %arg6: memref<32x32xf32, #tpu.memory_space<vmem>>, %arg7: memref<1x32xf32, #tpu.memory_space<vmem>>, %arg8: memref<32x32xf32, #tpu.memory_space<vmem>>, %arg9: memref<1x32xf32, #tpu.memory_space<vmem>>, %arg10: memref<1x32xf32, #tpu.memory_space<vmem>>, %arg11: memref<1x32xf32, #tpu.memory_space<vmem>>, %arg12: memref<64x32xf32, #tpu.memory_space<vmem>>, %arg13: memref<1x64xf32, #tpu.memory_space<vmem>>, %arg14: memref<32x64xf32, #tpu.memory_space<vmem>>, %arg15: memref<1x32xf32, #tpu.memory_space<vmem>>, %arg16: memref<1x32xf32, #tpu.memory_space<vmem>>, %arg17: memref<1x32xf32, #tpu.memory_space<vmem>>, %arg18: memref<1x8x32xf32, #tpu.memory_space<vmem>>, %arg19: memref<1x8x32xf32, #tpu.memory_space<vmem>>) attributes {dimension_semantics = [#tpu.dimension_semantics<parallel>], iteration_bounds = array<i64: 2>, scalar_prefetch = 0 : i64, scratch_operands = 1 : i64, tpu.core_type = #tpu.core_type<tc>, window_params = [{transform_indices = @transform_0, window_bounds = array<i64: 1, 8, 32>}, {pipeline_mode = #tpu.pipeline_mode<synchronous>, transform_indices = @transform_1, window_bounds = array<i64: 32, 32>}, {pipeline_mode = #tpu.pipeline_mode<synchronous>, transform_indices = @transform_2, window_bounds = array<i64: 1, 32>}, {pipeline_mode = #tpu.pipeline_mode<synchronous>, transform_indices = @transform_3, window_bounds = array<i64: 32, 32>}, {pipeline_mode = #tpu.pipeline_mode<synchronous>, transform_indices = @transform_4, window_bounds = array<i64: 1, 32>}, {pipeline_mode = #tpu.pipeline_mode<synchronous>, transform_indices = @transform_5, window_bounds = array<i64: 32, 32>}, {pipeline_mode = #tpu.pipeline_mode<synchronous>, transform_indices = @transform_6, window_bounds = array<i64: 1, 32>}, {pipeline_mode = #tpu.pipeline_mode<synchronous>, transform_indices = @transform_7, window_bounds = array<i64: 32, 32>}, {pipeline_mode = #tpu.pipeline_mode<synchronous>, transform_indices = @transform_8, window_bounds = array<i64: 1, 32>}, {pipeline_mode = #tpu.pipeline_mode<synchronous>, transform_indices = @transform_9, window_bounds = array<i64: 1, 32>}, {pipeline_mode = #tpu.pipeline_mode<synchronous>, transform_indices = @transform_10, window_bounds = array<i64: 1, 32>}, {pipeline_mode = #tpu.pipeline_mode<synchronous>, transform_indices = @transform_11, window_bounds = array<i64: 64, 32>}, {pipeline_mode = #tpu.pipeline_mode<synchronous>, transform_indices = @transform_12, window_bounds = array<i64: 1, 64>}, {pipeline_mode = #tpu.pipeline_mode<synchronous>, transform_indices = @transform_13, window_bounds = array<i64: 32, 64>}, {pipeline_mode = #tpu.pipeline_mode<synchronous>, transform_indices = @transform_14, window_bounds = array<i64: 1, 32>}, {pipeline_mode = #tpu.pipeline_mode<synchronous>, transform_indices = @transform_15, window_bounds = array<i64: 1, 32>}, {pipeline_mode = #tpu.pipeline_mode<synchronous>, transform_indices = @transform_16, window_bounds = array<i64: 1, 32>}, {transform_indices = @transform_17, window_bounds = array<i64: 1, 8, 32>}]} {
    %c0 = arith.constant 0 : index
    %c0_0 = arith.constant 0 : index
    %c0_1 = arith.constant 0 : index
    %0 = vector.load %arg1[%c0, %c0_0, %c0_1] : memref<1x8x32xf32, #tpu.memory_space<vmem>>, vector<1x8x32xf32>
    %1 = vector.shape_cast %0 : vector<1x8x32xf32> to vector<8x32xf32>
    %c0_2 = arith.constant 0 : index
    %c0_3 = arith.constant 0 : index
    %2 = vector.load %arg2[%c0_2, %c0_3] : memref<32x32xf32, #tpu.memory_space<vmem>>, vector<32x32xf32>
    %c0_4 = arith.constant 0 : index
    %c0_5 = arith.constant 0 : index
    %3 = vector.load %arg3[%c0_4, %c0_5] : memref<1x32xf32, #tpu.memory_space<vmem>>, vector<1x32xf32>
    %cst = arith.constant dense<0.000000e+00> : vector<8x32xf32>
    %4 = tpu.matmul %1, %2, %cst {dimension_numbers = #tpu.dot_dimension_numbers<[1], [1], [0], [0], [0, 0, 1, 0], [], []>} : vector<8x32xf32>, vector<32x32xf32>, vector<8x32xf32> -> vector<8x32xf32>
    %5 = vector.broadcast %3 : vector<1x32xf32> to vector<8x32xf32>
    %6 = arith.addf %4, %5 : vector<8x32xf32>
    %c0_6 = arith.constant 0 : index
    %c0_7 = arith.constant 0 : index
    %7 = vector.load %arg4[%c0_6, %c0_7] : memref<32x32xf32, #tpu.memory_space<vmem>>, vector<32x32xf32>
    %c0_8 = arith.constant 0 : index
    %c0_9 = arith.constant 0 : index
    %8 = vector.load %arg5[%c0_8, %c0_9] : memref<1x32xf32, #tpu.memory_space<vmem>>, vector<1x32xf32>
    %cst_10 = arith.constant dense<0.000000e+00> : vector<8x32xf32>
    %9 = tpu.matmul %1, %7, %cst_10 {dimension_numbers = #tpu.dot_dimension_numbers<[1], [1], [0], [0], [0, 0, 1, 0], [], []>} : vector<8x32xf32>, vector<32x32xf32>, vector<8x32xf32> -> vector<8x32xf32>
    %10 = vector.broadcast %8 : vector<1x32xf32> to vector<8x32xf32>
    %11 = arith.addf %9, %10 : vector<8x32xf32>
    %c0_11 = arith.constant 0 : index
    %c0_12 = arith.constant 0 : index
    %12 = vector.load %arg6[%c0_11, %c0_12] : memref<32x32xf32, #tpu.memory_space<vmem>>, vector<32x32xf32>
    %c0_13 = arith.constant 0 : index
    %c0_14 = arith.constant 0 : index
    %13 = vector.load %arg7[%c0_13, %c0_14] : memref<1x32xf32, #tpu.memory_space<vmem>>, vector<1x32xf32>
    %cst_15 = arith.constant dense<0.000000e+00> : vector<8x32xf32>
    %14 = tpu.matmul %1, %12, %cst_15 {dimension_numbers = #tpu.dot_dimension_numbers<[1], [1], [0], [0], [0, 0, 1, 0], [], []>} : vector<8x32xf32>, vector<32x32xf32>, vector<8x32xf32> -> vector<8x32xf32>
    %15 = vector.broadcast %13 : vector<1x32xf32> to vector<8x32xf32>
    %16 = arith.addf %14, %15 : vector<8x32xf32>
    %cst_16 = arith.constant 0.353553385 : f32
    %17 = vector.broadcast %cst_16 : f32 to vector<8x32xf32>
    %18 = arith.mulf %6, %17 : vector<8x32xf32>
    %19 = vector.shape_cast %18 : vector<8x32xf32> to vector<1x8x32xf32>
    %20 = vector.shape_cast %11 : vector<8x32xf32> to vector<1x8x32xf32>
    %21 = vector.shape_cast %16 : vector<8x32xf32> to vector<1x8x32xf32>
    %22 = vector.extract_strided_slice %19 {offsets = [0, 0, 0], sizes = [1, 8, 8], strides = [1, 1, 1]} : vector<1x8x32xf32> to vector<1x8x8xf32>
    %23 = vector.extract_strided_slice %20 {offsets = [0, 0, 0], sizes = [1, 8, 8], strides = [1, 1, 1]} : vector<1x8x32xf32> to vector<1x8x8xf32>
    %24 = vector.extract_strided_slice %21 {offsets = [0, 0, 0], sizes = [1, 8, 8], strides = [1, 1, 1]} : vector<1x8x32xf32> to vector<1x8x8xf32>
    "tpu.trace_start"() <{level = 10 : i32, message = "bqd,bkd->bqk"}> : () -> ()
    %cst_17 = arith.constant dense<0.000000e+00> : vector<1x8x8xf32>
    %25 = tpu.matmul %22, %23, %cst_17 {dimension_numbers = #tpu.dot_dimension_numbers<[2], [2], [1], [1], [0, 0, 0, 1, 1, 1], [0], [0]>} : vector<1x8x8xf32>, vector<1x8x8xf32>, vector<1x8x8xf32> -> vector<1x8x8xf32>
    "tpu.trace_stop"() : () -> ()
    %cst_18 = arith.constant dense<0xFF800000> : vector<1x8xf32>
    %26 = vector.multi_reduction <maximumf>, %25, %cst_18 [2] : vector<1x8x8xf32> to vector<1x8xf32>
    %27 = vector.shape_cast %26 : vector<1x8xf32> to vector<1x8x1xf32>
    %28 = vector.broadcast %27 : vector<1x8x1xf32> to vector<1x8x8xf32>
    %29 = arith.subf %25, %28 : vector<1x8x8xf32>
    %30 = math.exp %29 : vector<1x8x8xf32>
    %cst_19 = arith.constant dense<0.000000e+00> : vector<1x8xf32>
    %31 = vector.multi_reduction <add>, %30, %cst_19 [2] : vector<1x8x8xf32> to vector<1x8xf32>
    %32 = vector.shape_cast %31 : vector<1x8xf32> to vector<1x8x1xf32>
    %33 = tpu.reciprocal %32 {approx = true} : vector<1x8x1xf32> -> vector<1x8x1xf32>
    "tpu.trace_start"() <{level = 10 : i32, message = "bqk,bkd->bqd"}> : () -> ()
    %cst_20 = arith.constant dense<0.000000e+00> : vector<1x8x8xf32>
    %34 = tpu.matmul %30, %24, %cst_20 {dimension_numbers = #tpu.dot_dimension_numbers<[2], [1], [1], [2], [0, 0, 0, 1, 1, 2], [0], [0]>} : vector<1x8x8xf32>, vector<1x8x8xf32>, vector<1x8x8xf32> -> vector<1x8x8xf32>
    "tpu.trace_stop"() : () -> ()
    %35 = vector.broadcast %33 : vector<1x8x1xf32> to vector<1x8x8xf32>
    %36 = arith.mulf %34, %35 : vector<1x8x8xf32>
    %c0_21 = arith.constant 0 : index
    %c0_22 = arith.constant 0 : index
    %c0_23 = arith.constant 0 : index
    %37 = vector.load %arg19[%c0_21, %c0_22, %c0_23] : memref<1x8x32xf32, #tpu.memory_space<vmem>>, vector<1x8x8xf32>
    tpu.vector_store %arg19[%c0_21, %c0_22, %c0_23], %36 {strides = array<i32>} : memref<1x8x32xf32, #tpu.memory_space<vmem>>, vector<1x8x8xf32>,
    %38 = vector.extract_strided_slice %19 {offsets = [0, 0, 8], sizes = [1, 8, 8], strides = [1, 1, 1]} : vector<1x8x32xf32> to vector<1x8x8xf32>
    %39 = vector.extract_strided_slice %20 {offsets = [0, 0, 8], sizes = [1, 8, 8], strides = [1, 1, 1]} : vector<1x8x32xf32> to vector<1x8x8xf32>
    %40 = vector.extract_strided_slice %21 {offsets = [0, 0, 8], sizes = [1, 8, 8], strides = [1, 1, 1]} : vector<1x8x32xf32> to vector<1x8x8xf32>
    "tpu.trace_start"() <{level = 10 : i32, message = "bqd,bkd->bqk"}> : () -> ()
    %cst_24 = arith.constant dense<0.000000e+00> : vector<1x8x8xf32>
    %41 = tpu.matmul %38, %39, %cst_24 {dimension_numbers = #tpu.dot_dimension_numbers<[2], [2], [1], [1], [0, 0, 0, 1, 1, 1], [0], [0]>} : vector<1x8x8xf32>, vector<1x8x8xf32>, vector<1x8x8xf32> -> vector<1x8x8xf32>
    "tpu.trace_stop"() : () -> ()
    %cst_25 = arith.constant dense<0xFF800000> : vector<1x8xf32>
    %42 = vector.multi_reduction <maximumf>, %41, %cst_25 [2] : vector<1x8x8xf32> to vector<1x8xf32>
    %43 = vector.shape_cast %42 : vector<1x8xf32> to vector<1x8x1xf32>
    %44 = vector.broadcast %43 : vector<1x8x1xf32> to vector<1x8x8xf32>
    %45 = arith.subf %41, %44 : vector<1x8x8xf32>
    %46 = math.exp %45 : vector<1x8x8xf32>
    %cst_26 = arith.constant dense<0.000000e+00> : vector<1x8xf32>
    %47 = vector.multi_reduction <add>, %46, %cst_26 [2] : vector<1x8x8xf32> to vector<1x8xf32>
    %48 = vector.shape_cast %47 : vector<1x8xf32> to vector<1x8x1xf32>
    %49 = tpu.reciprocal %48 {approx = true} : vector<1x8x1xf32> -> vector<1x8x1xf32>
    "tpu.trace_start"() <{level = 10 : i32, message = "bqk,bkd->bqd"}> : () -> ()
    %cst_27 = arith.constant dense<0.000000e+00> : vector<1x8x8xf32>
    %50 = tpu.matmul %46, %40, %cst_27 {dimension_numbers = #tpu.dot_dimension_numbers<[2], [1], [1], [2], [0, 0, 0, 1, 1, 2], [0], [0]>} : vector<1x8x8xf32>, vector<1x8x8xf32>, vector<1x8x8xf32> -> vector<1x8x8xf32>
    "tpu.trace_stop"() : () -> ()
    %51 = vector.broadcast %49 : vector<1x8x1xf32> to vector<1x8x8xf32>
    %52 = arith.mulf %50, %51 : vector<1x8x8xf32>
    %c0_28 = arith.constant 0 : index
    %c0_29 = arith.constant 0 : index
    %c8 = arith.constant 8 : index
    %53 = vector.load %arg19[%c0_28, %c0_29, %c8] : memref<1x8x32xf32, #tpu.memory_space<vmem>>, vector<1x8x8xf32>
    tpu.vector_store %arg19[%c0_28, %c0_29, %c8], %52 {strides = array<i32>} : memref<1x8x32xf32, #tpu.memory_space<vmem>>, vector<1x8x8xf32>,
    %54 = vector.extract_strided_slice %19 {offsets = [0, 0, 16], sizes = [1, 8, 8], strides = [1, 1, 1]} : vector<1x8x32xf32> to vector<1x8x8xf32>
    %55 = vector.extract_strided_slice %20 {offsets = [0, 0, 16], sizes = [1, 8, 8], strides = [1, 1, 1]} : vector<1x8x32xf32> to vector<1x8x8xf32>
    %56 = vector.extract_strided_slice %21 {offsets = [0, 0, 16], sizes = [1, 8, 8], strides = [1, 1, 1]} : vector<1x8x32xf32> to vector<1x8x8xf32>
    "tpu.trace_start"() <{level = 10 : i32, message = "bqd,bkd->bqk"}> : () -> ()
    %cst_30 = arith.constant dense<0.000000e+00> : vector<1x8x8xf32>
    %57 = tpu.matmul %54, %55, %cst_30 {dimension_numbers = #tpu.dot_dimension_numbers<[2], [2], [1], [1], [0, 0, 0, 1, 1, 1], [0], [0]>} : vector<1x8x8xf32>, vector<1x8x8xf32>, vector<1x8x8xf32> -> vector<1x8x8xf32>
    "tpu.trace_stop"() : () -> ()
    %cst_31 = arith.constant dense<0xFF800000> : vector<1x8xf32>
    %58 = vector.multi_reduction <maximumf>, %57, %cst_31 [2] : vector<1x8x8xf32> to vector<1x8xf32>
    %59 = vector.shape_cast %58 : vector<1x8xf32> to vector<1x8x1xf32>
    %60 = vector.broadcast %59 : vector<1x8x1xf32> to vector<1x8x8xf32>
    %61 = arith.subf %57, %60 : vector<1x8x8xf32>
    %62 = math.exp %61 : vector<1x8x8xf32>
    %cst_32 = arith.constant dense<0.000000e+00> : vector<1x8xf32>
    %63 = vector.multi_reduction <add>, %62, %cst_32 [2] : vector<1x8x8xf32> to vector<1x8xf32>
    %64 = vector.shape_cast %63 : vector<1x8xf32> to vector<1x8x1xf32>
    %65 = tpu.reciprocal %64 {approx = true} : vector<1x8x1xf32> -> vector<1x8x1xf32>
    "tpu.trace_start"() <{level = 10 : i32, message = "bqk,bkd->bqd"}> : () -> ()
    %cst_33 = arith.constant dense<0.000000e+00> : vector<1x8x8xf32>
    %66 = tpu.matmul %62, %56, %cst_33 {dimension_numbers = #tpu.dot_dimension_numbers<[2], [1], [1], [2], [0, 0, 0, 1, 1, 2], [0], [0]>} : vector<1x8x8xf32>, vector<1x8x8xf32>, vector<1x8x8xf32> -> vector<1x8x8xf32>
    "tpu.trace_stop"() : () -> ()
    %67 = vector.broadcast %65 : vector<1x8x1xf32> to vector<1x8x8xf32>
    %68 = arith.mulf %66, %67 : vector<1x8x8xf32>
    %c0_34 = arith.constant 0 : index
    %c0_35 = arith.constant 0 : index
    %c16 = arith.constant 16 : index
    %69 = vector.load %arg19[%c0_34, %c0_35, %c16] : memref<1x8x32xf32, #tpu.memory_space<vmem>>, vector<1x8x8xf32>
    tpu.vector_store %arg19[%c0_34, %c0_35, %c16], %68 {strides = array<i32>} : memref<1x8x32xf32, #tpu.memory_space<vmem>>, vector<1x8x8xf32>,
    %70 = vector.extract_strided_slice %19 {offsets = [0, 0, 24], sizes = [1, 8, 8], strides = [1, 1, 1]} : vector<1x8x32xf32> to vector<1x8x8xf32>
    %71 = vector.extract_strided_slice %20 {offsets = [0, 0, 24], sizes = [1, 8, 8], strides = [1, 1, 1]} : vector<1x8x32xf32> to vector<1x8x8xf32>
    %72 = vector.extract_strided_slice %21 {offsets = [0, 0, 24], sizes = [1, 8, 8], strides = [1, 1, 1]} : vector<1x8x32xf32> to vector<1x8x8xf32>
    "tpu.trace_start"() <{level = 10 : i32, message = "bqd,bkd->bqk"}> : () -> ()
    %cst_36 = arith.constant dense<0.000000e+00> : vector<1x8x8xf32>
    %73 = tpu.matmul %70, %71, %cst_36 {dimension_numbers = #tpu.dot_dimension_numbers<[2], [2], [1], [1], [0, 0, 0, 1, 1, 1], [0], [0]>} : vector<1x8x8xf32>, vector<1x8x8xf32>, vector<1x8x8xf32> -> vector<1x8x8xf32>
    "tpu.trace_stop"() : () -> ()
    %cst_37 = arith.constant dense<0xFF800000> : vector<1x8xf32>
    %74 = vector.multi_reduction <maximumf>, %73, %cst_37 [2] : vector<1x8x8xf32> to vector<1x8xf32>
    %75 = vector.shape_cast %74 : vector<1x8xf32> to vector<1x8x1xf32>
    %76 = vector.broadcast %75 : vector<1x8x1xf32> to vector<1x8x8xf32>
    %77 = arith.subf %73, %76 : vector<1x8x8xf32>
    %78 = math.exp %77 : vector<1x8x8xf32>
    %cst_38 = arith.constant dense<0.000000e+00> : vector<1x8xf32>
    %79 = vector.multi_reduction <add>, %78, %cst_38 [2] : vector<1x8x8xf32> to vector<1x8xf32>
    %80 = vector.shape_cast %79 : vector<1x8xf32> to vector<1x8x1xf32>
    %81 = tpu.reciprocal %80 {approx = true} : vector<1x8x1xf32> -> vector<1x8x1xf32>
    "tpu.trace_start"() <{level = 10 : i32, message = "bqk,bkd->bqd"}> : () -> ()
    %cst_39 = arith.constant dense<0.000000e+00> : vector<1x8x8xf32>
    %82 = tpu.matmul %78, %72, %cst_39 {dimension_numbers = #tpu.dot_dimension_numbers<[2], [1], [1], [2], [0, 0, 0, 1, 1, 2], [0], [0]>} : vector<1x8x8xf32>, vector<1x8x8xf32>, vector<1x8x8xf32> -> vector<1x8x8xf32>
    "tpu.trace_stop"() : () -> ()
    %83 = vector.broadcast %81 : vector<1x8x1xf32> to vector<1x8x8xf32>
    %84 = arith.mulf %82, %83 : vector<1x8x8xf32>
    %c0_40 = arith.constant 0 : index
    %c0_41 = arith.constant 0 : index
    %c24 = arith.constant 24 : index
    %85 = vector.load %arg19[%c0_40, %c0_41, %c24] : memref<1x8x32xf32, #tpu.memory_space<vmem>>, vector<1x8x8xf32>
    tpu.vector_store %arg19[%c0_40, %c0_41, %c24], %84 {strides = array<i32>} : memref<1x8x32xf32, #tpu.memory_space<vmem>>, vector<1x8x8xf32>,
    %c0_42 = arith.constant 0 : index
    %c0_43 = arith.constant 0 : index
    %c0_44 = arith.constant 0 : index
    %86 = vector.load %arg19[%c0_42, %c0_43, %c0_44] : memref<1x8x32xf32, #tpu.memory_space<vmem>>, vector<1x8x32xf32>
    %87 = vector.shape_cast %86 : vector<1x8x32xf32> to vector<8x32xf32>
    %c0_45 = arith.constant 0 : index
    %c0_46 = arith.constant 0 : index
    %88 = vector.load %arg8[%c0_45, %c0_46] : memref<32x32xf32, #tpu.memory_space<vmem>>, vector<32x32xf32>
    %c0_47 = arith.constant 0 : index
    %c0_48 = arith.constant 0 : index
    %89 = vector.load %arg9[%c0_47, %c0_48] : memref<1x32xf32, #tpu.memory_space<vmem>>, vector<1x32xf32>
    %cst_49 = arith.constant dense<0.000000e+00> : vector<8x32xf32>
    %90 = tpu.matmul %87, %88, %cst_49 {dimension_numbers = #tpu.dot_dimension_numbers<[1], [1], [0], [0], [0, 0, 1, 0], [], []>} : vector<8x32xf32>, vector<32x32xf32>, vector<8x32xf32> -> vector<8x32xf32>
    %91 = vector.broadcast %89 : vector<1x32xf32> to vector<8x32xf32>
    %92 = arith.addf %90, %91 : vector<8x32xf32>
    %c0_50 = arith.constant 0 : index
    %c0_51 = arith.constant 0 : index
    %c0_52 = arith.constant 0 : index
    %93 = vector.load %arg1[%c0_50, %c0_51, %c0_52] : memref<1x8x32xf32, #tpu.memory_space<vmem>>, vector<1x8x32xf32>
    %94 = vector.shape_cast %93 : vector<1x8x32xf32> to vector<8x32xf32>
    %95 = arith.addf %94, %92 : vector<8x32xf32>
    %c0_53 = arith.constant 0 : index
    %c0_54 = arith.constant 0 : index
    %96 = vector.load %arg10[%c0_53, %c0_54] : memref<1x32xf32, #tpu.memory_space<vmem>>, vector<1x32xf32>
    %c0_55 = arith.constant 0 : index
    %c0_56 = arith.constant 0 : index
    %97 = vector.load %arg11[%c0_55, %c0_56] : memref<1x32xf32, #tpu.memory_space<vmem>>, vector<1x32xf32>
    %cst_57 = arith.constant dense<0.000000e+00> : vector<8xf32>
    %98 = vector.multi_reduction <add>, %95, %cst_57 [1] : vector<8x32xf32> to vector<8xf32>
    %99 = vector.shape_cast %98 : vector<8xf32> to vector<8x1xf32>
    %cst_58 = arith.constant 3.200000e+01 : f32
    %100 = vector.broadcast %cst_58 : f32 to vector<8x1xf32>
    %101 = arith.divf %99, %100 : vector<8x1xf32>
    %102 = arith.mulf %95, %95 : vector<8x32xf32>
    %cst_59 = arith.constant dense<0.000000e+00> : vector<8xf32>
    %103 = vector.multi_reduction <add>, %102, %cst_59 [1] : vector<8x32xf32> to vector<8xf32>
    %104 = vector.shape_cast %103 : vector<8xf32> to vector<8x1xf32>
    %cst_60 = arith.constant 3.200000e+01 : f32
    %105 = vector.broadcast %cst_60 : f32 to vector<8x1xf32>
    %106 = arith.divf %104, %105 : vector<8x1xf32>
    %107 = arith.mulf %101, %101 : vector<8x1xf32>
    %108 = arith.subf %106, %107 : vector<8x1xf32>
    %109 = vector.broadcast %101 : vector<8x1xf32> to vector<8x32xf32>
    %110 = arith.subf %95, %109 : vector<8x32xf32>
    %cst_61 = arith.constant 9.99999974E-6 : f32
    %111 = vector.broadcast %cst_61 : f32 to vector<8x1xf32>
    %112 = arith.addf %108, %111 : vector<8x1xf32>
    %113 = math.rsqrt %112 : vector<8x1xf32>
    %114 = vector.broadcast %113 : vector<8x1xf32> to vector<8x32xf32>
    %115 = arith.mulf %110, %114 : vector<8x32xf32>
    %116 = vector.broadcast %96 : vector<1x32xf32> to vector<8x32xf32>
    %117 = arith.mulf %115, %116 : vector<8x32xf32>
    %118 = vector.broadcast %97 : vector<1x32xf32> to vector<8x32xf32>
    %119 = arith.addf %117, %118 : vector<8x32xf32>
    %cst_62 = arith.constant 0.000000e+00 : f32
    %120 = vector.broadcast %cst_62 : f32 to vector<8x32xf32>
    %c0_63 = arith.constant 0 : index
    %c0_64 = arith.constant 0 : index
    %121 = vector.load %arg12[%c0_63, %c0_64] : memref<64x32xf32, #tpu.memory_space<vmem>>, vector<64x32xf32>
    %cst_65 = arith.constant dense<0.000000e+00> : vector<8x64xf32>
    %122 = tpu.matmul %119, %121, %cst_65 {dimension_numbers = #tpu.dot_dimension_numbers<[1], [1], [0], [0], [0, 0, 1, 0], [], []>} : vector<8x32xf32>, vector<64x32xf32>, vector<8x64xf32> -> vector<8x64xf32>
    %c0_66 = arith.constant 0 : index
    %c0_67 = arith.constant 0 : index
    %123 = vector.load %arg13[%c0_66, %c0_67] : memref<1x64xf32, #tpu.memory_space<vmem>>, vector<1x64xf32>
    %124 = vector.broadcast %123 : vector<1x64xf32> to vector<8x64xf32>
    %125 = arith.addf %122, %124 : vector<8x64xf32>
    %cst_68 = arith.constant 0.000000e+00 : f32
    %126 = vector.broadcast %cst_68 : f32 to vector<8x64xf32>
    %127 = arith.maximumf %125, %126 : vector<8x64xf32>
    %c0_69 = arith.constant 0 : index
    %c0_70 = arith.constant 0 : index
    %128 = vector.load %arg14[%c0_69, %c0_70] : memref<32x64xf32, #tpu.memory_space<vmem>>, vector<32x64xf32>
    %cst_71 = arith.constant dense<0.000000e+00> : vector<8x32xf32>
    %129 = tpu.matmul %127, %128, %cst_71 {dimension_numbers = #tpu.dot_dimension_numbers<[1], [1], [0], [0], [0, 0, 1, 0], [], []>} : vector<8x64xf32>, vector<32x64xf32>, vector<8x32xf32> -> vector<8x32xf32>
    %130 = arith.addf %120, %129 : vector<8x32xf32>
    %c0_72 = arith.constant 0 : index
    %c0_73 = arith.constant 0 : index
    %131 = vector.load %arg15[%c0_72, %c0_73] : memref<1x32xf32, #tpu.memory_space<vmem>>, vector<1x32xf32>
    %132 = vector.broadcast %131 : vector<1x32xf32> to vector<8x32xf32>
    %133 = arith.addf %130, %132 : vector<8x32xf32>
    %134 = arith.addf %119, %133 : vector<8x32xf32>
    %c0_74 = arith.constant 0 : index
    %c0_75 = arith.constant 0 : index
    %135 = vector.load %arg16[%c0_74, %c0_75] : memref<1x32xf32, #tpu.memory_space<vmem>>, vector<1x32xf32>
    %c0_76 = arith.constant 0 : index
    %c0_77 = arith.constant 0 : index
    %136 = vector.load %arg17[%c0_76, %c0_77] : memref<1x32xf32, #tpu.memory_space<vmem>>, vector<1x32xf32>
    %cst_78 = arith.constant dense<0.000000e+00> : vector<8xf32>
    %137 = vector.multi_reduction <add>, %134, %cst_78 [1] : vector<8x32xf32> to vector<8xf32>
    %138 = vector.shape_cast %137 : vector<8xf32> to vector<8x1xf32>
    %cst_79 = arith.constant 3.200000e+01 : f32
    %139 = vector.broadcast %cst_79 : f32 to vector<8x1xf32>
    %140 = arith.divf %138, %139 : vector<8x1xf32>
    %141 = arith.mulf %134, %134 : vector<8x32xf32>
    %cst_80 = arith.constant dense<0.000000e+00> : vector<8xf32>
    %142 = vector.multi_reduction <add>, %141, %cst_80 [1] : vector<8x32xf32> to vector<8xf32>
    %143 = vector.shape_cast %142 : vector<8xf32> to vector<8x1xf32>
    %cst_81 = arith.constant 3.200000e+01 : f32
    %144 = vector.broadcast %cst_81 : f32 to vector<8x1xf32>
    %145 = arith.divf %143, %144 : vector<8x1xf32>
    %146 = arith.mulf %140, %140 : vector<8x1xf32>
    %147 = arith.subf %145, %146 : vector<8x1xf32>
    %148 = vector.broadcast %140 : vector<8x1xf32> to vector<8x32xf32>
    %149 = arith.subf %134, %148 : vector<8x32xf32>
    %cst_82 = arith.constant 9.99999974E-6 : f32
    %150 = vector.broadcast %cst_82 : f32 to vector<8x1xf32>
    %151 = arith.addf %147, %150 : vector<8x1xf32>
    %152 = math.rsqrt %151 : vector<8x1xf32>
    %153 = vector.broadcast %152 : vector<8x1xf32> to vector<8x32xf32>
    %154 = arith.mulf %149, %153 : vector<8x32xf32>
    %155 = vector.broadcast %135 : vector<1x32xf32> to vector<8x32xf32>
    %156 = arith.mulf %154, %155 : vector<8x32xf32>
    %157 = vector.broadcast %136 : vector<1x32xf32> to vector<8x32xf32>
    %158 = arith.addf %156, %157 : vector<8x32xf32>
    %159 = vector.shape_cast %158 : vector<8x32xf32> to vector<1x8x32xf32>
    %c0_83 = arith.constant 0 : index
    %c0_84 = arith.constant 0 : index
    %c0_85 = arith.constant 0 : index
    %160 = vector.load %arg18[%c0_83, %c0_84, %c0_85] : memref<1x8x32xf32, #tpu.memory_space<vmem>>, vector<1x8x32xf32>
    tpu.vector_store %arg18[%c0_83, %c0_84, %c0_85], %159 {strides = array<i32>} : memref<1x8x32xf32, #tpu.memory_space<vmem>>, vector<1x8x32xf32>,
    return
  }
  func.func @transform_0(%arg0: i32) -> (i32, i32, i32) {
    %c0_i32 = arith.constant 0 : i32
    %c0_i32_0 = arith.constant 0 : i32
    %c0_i32_1 = arith.constant 0 : i32
    return %arg0, %c0_i32, %c0_i32_0 : i32, i32, i32
  }
  func.func @transform_1(%arg0: i32) -> (i32, i32) {
    %c0_i32 = arith.constant 0 : i32
    %c0_i32_0 = arith.constant 0 : i32
    %c0_i32_1 = arith.constant 0 : i32
    return %c0_i32, %c0_i32_0 : i32, i32
  }
  func.func @transform_2(%arg0: i32) -> (i32, i32) {
    %c0_i32 = arith.constant 0 : i32
    %c0_i32_0 = arith.constant 0 : i32
    %c0_i32_1 = arith.constant 0 : i32
    return %c0_i32, %c0_i32_0 : i32, i32
  }
  func.func @transform_3(%arg0: i32) -> (i32, i32) {
    %c0_i32 = arith.constant 0 : i32
    %c0_i32_0 = arith.constant 0 : i32
    %c0_i32_1 = arith.constant 0 : i32
    return %c0_i32, %c0_i32_0 : i32, i32
  }
  func.func @transform_4(%arg0: i32) -> (i32, i32) {
    %c0_i32 = arith.constant 0 : i32
    %c0_i32_0 = arith.constant 0 : i32
    %c0_i32_1 = arith.constant 0 : i32
    return %c0_i32, %c0_i32_0 : i32, i32
  }
  func.func @transform_5(%arg0: i32) -> (i32, i32) {
    %c0_i32 = arith.constant 0 : i32
    %c0_i32_0 = arith.constant 0 : i32
    %c0_i32_1 = arith.constant 0 : i32
    return %c0_i32, %c0_i32_0 : i32, i32
  }
  func.func @transform_6(%arg0: i32) -> (i32, i32) {
    %c0_i32 = arith.constant 0 : i32
    %c0_i32_0 = arith.constant 0 : i32
    %c0_i32_1 = arith.constant 0 : i32
    return %c0_i32, %c0_i32_0 : i32, i32
  }
  func.func @transform_7(%arg0: i32) -> (i32, i32) {
    %c0_i32 = arith.constant 0 : i32
    %c0_i32_0 = arith.constant 0 : i32
    %c0_i32_1 = arith.constant 0 : i32
    return %c0_i32, %c0_i32_0 : i32, i32
  }
  func.func @transform_8(%arg0: i32) -> (i32, i32) {
    %c0_i32 = arith.constant 0 : i32
    %c0_i32_0 = arith.constant 0 : i32
    %c0_i32_1 = arith.constant 0 : i32
    return %c0_i32, %c0_i32_0 : i32, i32
  }
  func.func @transform_9(%arg0: i32) -> (i32, i32) {
    %c0_i32 = arith.constant 0 : i32
    %c0_i32_0 = arith.constant 0 : i32
    %c0_i32_1 = arith.constant 0 : i32
    return %c0_i32, %c0_i32_0 : i32, i32
  }
  func.func @transform_10(%arg0: i32) -> (i32, i32) {
    %c0_i32 = arith.constant 0 : i32
    %c0_i32_0 = arith.constant 0 : i32
    %c0_i32_1 = arith.constant 0 : i32
    return %c0_i32, %c0_i32_0 : i32, i32
  }
  func.func @transform_11(%arg0: i32) -> (i32, i32) {
    %c0_i32 = arith.constant 0 : i32
    %c0_i32_0 = arith.constant 0 : i32
    %c0_i32_1 = arith.constant 0 : i32
    return %c0_i32, %c0_i32_0 : i32, i32
  }
  func.func @transform_12(%arg0: i32) -> (i32, i32) {
    %c0_i32 = arith.constant 0 : i32
    %c0_i32_0 = arith.constant 0 : i32
    %c0_i32_1 = arith.constant 0 : i32
    return %c0_i32, %c0_i32_0 : i32, i32
  }
  func.func @transform_13(%arg0: i32) -> (i32, i32) {
    %c0_i32 = arith.constant 0 : i32
    %c0_i32_0 = arith.constant 0 : i32
    %c0_i32_1 = arith.constant 0 : i32
    return %c0_i32, %c0_i32_0 : i32, i32
  }
  func.func @transform_14(%arg0: i32) -> (i32, i32) {
    %c0_i32 = arith.constant 0 : i32
    %c0_i32_0 = arith.constant 0 : i32
    %c0_i32_1 = arith.constant 0 : i32
    return %c0_i32, %c0_i32_0 : i32, i32
  }
  func.func @transform_15(%arg0: i32) -> (i32, i32) {
    %c0_i32 = arith.constant 0 : i32
    %c0_i32_0 = arith.constant 0 : i32
    %c0_i32_1 = arith.constant 0 : i32
    return %c0_i32, %c0_i32_0 : i32, i32
  }
  func.func @transform_16(%arg0: i32) -> (i32, i32) {
    %c0_i32 = arith.constant 0 : i32
    %c0_i32_0 = arith.constant 0 : i32
    %c0_i32_1 = arith.constant 0 : i32
    return %c0_i32, %c0_i32_0 : i32, i32
  }
  func.func @transform_17(%arg0: i32) -> (i32, i32, i32) {
    %c0_i32 = arith.constant 0 : i32
    %c0_i32_0 = arith.constant 0 : i32
    %c0_i32_1 = arith.constant 0 : i32
    return %arg0, %c0_i32, %c0_i32_0 : i32, i32, i32
  }
}

</mosaic_0001>

<bundles_post_ra>
// kernel: tpu_custom_call.1
= control target key start
LH: loop header
LB: loop body
LE: loop exit
PB: predicated region body
PF: predicated region fallthrough
CT: control target
= control target key end

     0   :  { %s3136_s0 = inlined_call_operand.hbm [shape: f32[2,8,32], index: 0, kind: input, shape index: {}]   ;;  %s3137_s1 = inlined_call_operand.vmem [shape: f32[32,32], index: 1, kind: input, shape index: {}]   ;;  %s3138_s2 = inlined_call_operand.vmem [shape: f32[1,32], index: 2, kind: input, shape index: {}]   ;;  %s3139_s3 = inlined_call_operand.vmem [shape: f32[32,32], index: 3, kind: input, shape index: {}]   ;;  %s3140_s4 = inlined_call_operand.vmem [shape: f32[1,32], index: 4, kind: input, shape index: {}]   ;;  %s3141_s5 = inlined_call_operand.vmem [shape: f32[32,32], index: 5, kind: input, shape index: {}]   ;;  %s3142_s6 = inlined_call_operand.vmem [shape: f32[1,32], index: 6, kind: input, shape index: {}]   ;;  %s3143_s7 = inlined_call_operand.hbm [shape: f32[32,32], index: 7, kind: input, shape index: {}]   ;;  %s3144_s8 = inlined_call_operand.vmem [shape: f32[1,32], index: 8, kind: input, shape index: {}]   ;;  %s3145_s9 = inlined_call_operand.vmem [shape: f32[1,32], index: 9, kind: input, shape index: {}]   ;;  %s3146_s10 = inlined_call_operand.vmem [shape: f32[1,32], index: 10, kind: input, shape index: {}]   ;;  %s3147_s11 = inlined_call_operand.vmem [shape: f32[64,32], index: 11, kind: input, shape index: {}]   ;;  %s3148_s12 = inlined_call_operand.vmem [shape: f32[1,64], index: 12, kind: input, shape index: {}]   ;;  %s3149_s13 = inlined_call_operand.hbm [shape: f32[32,64], index: 13, kind: input, shape index: {}]   ;;  %s3150_s14 = inlined_call_operand.vmem [shape: f32[1,32], index: 14, kind: input, shape index: {}]   ;;  %s3151_s15 = inlined_call_operand.vmem [shape: f32[1,32], index: 15, kind: input, shape index: {}]   ;;  %s3152_s16 = inlined_call_operand.vmem [shape: f32[1,32], index: 16, kind: input, shape index: {}]   ;;  %s3153_s17 = inlined_call_operand.hbm [shape: f32[2,8,32], index: 17, kind: output, shape index: {}]  }
   0x1   :  { %3163 = sst [smem:[#allocation15_spill]] %s3136_s0 }
   0x2   :  { %3164 = sst [smem:[#allocation16_spill]] %s3137_s1 }
   0x3   :  { %3165 = sst [smem:[#allocation17_spill]] %s3138_s2 }
   0x4   :  { %3166 = sst [smem:[#allocation18_spill]] %s3139_s3 }
   0x5   :  { %3167 = sst [smem:[#allocation19_spill]] %s3143_s7 }
   0x6   :  { %3168 = sst [smem:[#allocation20_spill]] %s3148_s12 }
   0x7   :  { %3169 = sst [smem:[#allocation21_spill]] %s3150_s14 }
   0x8   :  { %3170 = sst [smem:[#allocation22_spill]] %s3151_s15 }
   0x9   :  { %3171 = sst [smem:[#allocation23_spill]] %s3152_s16 }
   0xa   :  { %3172 = sst [smem:[#allocation24_spill]] %s3153_s17 }
   0xb   :  { %22 = vsyncpa [#allocation4], 0 }
   0xc   :  { %24 = vsyncpa [#allocation4 + $0x1], 0 }
   0xd   :  { %25 = vsyncpa [#allocation7], 0 }
   0xe   :  { %26 = vsyncpa [#allocation5], 0 }
   0xf   :  { %28 = vsyncpa [#allocation5 + $0x1], 0  ;;  %s2684_s24 = smov 0   ;;  %s2686_s25 = smov 0  }
  0x10   :  { %s2688_s26 = smov 0   ;;  %s2690_s27 = smov 0  }
  0x11 LB: > { %3173 = sst [smem:[#allocation13_spill]] %s2565_s24  ;;  %s2705_s28 = sadd.s32 4294967295, %s2577_s27   ;;  %s2577_s27 = sphi %s2690_s27, %s3205_s27   ;;  %s2573_s26 = sphi %s2688_s26, %s3204_s26   ;;  %s2569_s25 = sphi %s2686_s25, %s3203_s25   ;;  %s2565_s24 = sphi %s2684_s24, %s3202_s24  }
  0x12   : > { %s2031_s29 = sadd.s32 4294967294, %s2577_s27   ;;  %p54_p0 = scmp.ne.s32.totalorder %s2569_s25, %s2565_s24 }
  0x13   : > { %p3159_p1 = scmp.eq.s32.totalorder %s2705_s28, 0  ;;  %p420_p3 = scmp.eq.s32.totalorder %s2031_s29, 1 }
  0x14   : > { %p2032_p5 = scmp.ge.s32.totalorder %s2577_s27, 1  ;;  %p427_p7 = scmp.lt.s32.totalorder %s2577_s27, 3 }
  0x15   : > { %p2714_p4 = por %p3159_p1, %p54_p0  ;;  %p2719_p6 = por %p420_p3, %p54_p0 }
  0x16   : > { %p2724_p8 = pnand %p2032_p5, %p427_p7  ;;  %s2579_s19 = smov [#allocation6]  }
  0x17   : > { %s3174_s0 = scalar_select %p2714_p4, 1, 0 }
  0x18   : > { %s3175_s30 = scalar_select %p2719_p6, 1, 0 }
  0x19   : > { %s457_s1 = sshll.u32 %s2579_s19, 4  ;;  %p2335_p9 = pneg %p2724_p8  ;;  %s2728_s1 = int_to_ptr.vmem [resolvable:$true] %s457_s1 }
  0x1a   : > { %3176 = sst [smem:[#allocation14_spill]] %s3175_s30  ;;  %s2580_s21 = smov [#allocation8]  }
  0x1b   : > { %p2735_p11 = pnand %p2335_p9, %p3159_p1  ;;  %s485_s22 = sshll.u32 %s2580_s21, 4  ;;  %s2739_s22 = int_to_ptr.vmem [resolvable:$true] %s485_s22 }
  0x1c   : > { %s3179_s7 = sld [smem:[#allocation19_spill]] }
  0x1d   : > { %p2423_p13 = pneg %p2735_p11 }
  0x22   : > { %s2421_s19 = scalar_lea.hbm %s3179_s7, 512 }
  0x23   : > { %p2422_p12 = scmp.ne.s32.totalorder %s3179_s7, %s2421_s19  ;;  %p2428_p5 = scmp.lt.u32.totalorder %s2421_s19, %s3179_s7 }
  0x25   : > { %p2424_p0 = pnand %p2423_p13, %p2422_p12 }
  0x27   : > { %p2425_p3 = pneg %p2424_p0 }
  0x29   : > { %p2430_p7 = pnand %p2428_p5, %p2425_p3 }
  0x2b   : > { %2433 = shalt.err (!%p2430_p7)
}
  0x2c   : > { %s2434_s21 = scalar_lea.vmem %s2728_s1, 512  ;;  %p2442_p2 = scmp.lt.s32.totalorder %s2728_s1, %s2728_s1 }
  0x2d   : > { %p2435_p9 = scmp.ne.s32.totalorder %s2728_s1, %s2434_s21  ;;  %p2443_p12 = scmp.lt.s32.totalorder %s2434_s21, %s2434_s21 }
  0x2f   : > { %p2437_p10 = pnand %p2435_p9, %p2423_p13  ;;  %p2444_p0 = por %p2443_p12, %p2442_p2 }
  0x31   : > { %p2438_p1 = pneg %p2437_p10 }
  0x33   : > { %p2445_p6 = pnand %p2444_p0, %p2438_p1 }
  0x35   : > { %2448 = shalt.err (!%p2445_p6)
}
  0x36   : > { %s2581_s16 = smov 128   ;;  %s2582_s17 = smov 8  }
  0x37   : > { %2338 = dma.hbm_to_vmem [thread:$0]  (!%p2735_p11), %s3179_s7, 512, %s2728_s1, [#allocation7], %s2581_s16, %s2581_s16, %s2582_s17  }
  0x38   : > { %s2449_s19 = scalar_lea.hbm %s3149_s13, 512 }
  0x39   : > { %p2450_p2 = scmp.ne.s32.totalorder %s3149_s13, %s2449_s19  ;;  %p2456_p10 = scmp.lt.u32.totalorder %s2449_s19, %s3149_s13 }
  0x3b   : > { %p2452_p1 = pnand %p2450_p2, %p2423_p13 }
  0x3d   : > { %p2453_p6 = pneg %p2452_p1 }
  0x3f   : > { %p2458_p3 = pnand %p2456_p10, %p2453_p6 }
  0x41   : > { %2461 = shalt.err (!%p2458_p3)
}
  0x42   : > { %s2462_s1 = scalar_lea.vmem %s2739_s22, 512  ;;  %p2470_p12 = scmp.lt.s32.totalorder %s2739_s22, %s2739_s22 }
  0x43   : > { %p2463_p5 = scmp.ne.s32.totalorder %s2739_s22, %s2462_s1  ;;  %p2471_p0 = scmp.lt.s32.totalorder %s2462_s1, %s2462_s1 }
  0x45   : > { %p2465_p7 = pnand %p2463_p5, %p2423_p13  ;;  %p2472_p2 = por %p2471_p0, %p2470_p12 }
  0x47   : > { %p2466_p9 = pneg %p2465_p7 }
  0x49   : > { %p2473_p1 = pnand %p2472_p2, %p2466_p9 }
  0x4b   : > { %2476 = shalt.err (!%p2473_p1)
}
  0x4c   : > { %2341 = dma.hbm_to_vmem [thread:$0]  (!%p2735_p11), %s3149_s13, 512, %s2739_s22, [#allocation7], %s2581_s16, %s2581_s16, %s2582_s17  }
  0x4d   : > { %s2794_s15 = sadd.s32 1, %s2577_s27   ;;  %s41_s20 = sadd.s32 1, %s2573_s26 }
  0x4e   : > { %s38_s24 = ssub.s32 %s2577_s27, %s2794_s15  ;;  %p48_p13 = scmp.ne.s32.totalorder %s2573_s26, %s2569_s25 }
  0x4f   : > { %p39_p6 = scmp.eq.s32.totalorder %s38_s24, 0  ;;  %p49_p10 = scmp.eq.s32.totalorder %s2577_s27, 0 }
  0x50   : > { %p3180_p3 = scmp.eq.s32.totalorder %s2705_s28, 1  ;;  %p2352_p7 = scmp.lt.s32.totalorder %s2577_s27, 2 }
  0x51   : > { %s2810_s23 = scalar_select %p39_p6, %s2573_s26, %s41_s20  }
  0x52   : > { %p2804_p5 = por %p3180_p3, %p48_p13  ;;  %p50_p9 = por %p49_p10, %p48_p13 }
  0x53   : > { %s508_s29 = sand.u32 1, %s2573_s26   ;;  %s2037_s22 = sshll.u32 %s2577_s27, 7 }
  0x54   : > { %s3181_s30 = scalar_select %p2804_p5, 1, 0 }
  0x55   : > { %s2036_s19 = sshll.u32 %s508_s29, 3  ;;  %s3182_s21 = sld [smem:[#allocation15_spill]] }
  0x56   : > { %s512_s12 = scalar_lea.vmem [#allocation3], %s2036_s19  ;;  %p2821_p11 = pnand %p2352_p7, %p50_p9 }
  0x57   : > { %s519_s14 = sshll.u32 %s512_s12, 4  ;;  %s509_s24 = scalar_lea.sflag [#allocation4], %s508_s29  ;;  %s2819_s14 = int_to_ptr.vmem [resolvable:$true] %s519_s14 }
  0x58   : > { %p2479_p0 = pneg %p2821_p11 }
  0x5b   : > { %s2817_s1 = scalar_lea.hbm %s3182_s21, %s2037_s22  ;;  %s2482_s16 = scalar_lea.hbm %s3182_s21, 256 }
  0x5c   : > { %s2477_s7 = scalar_lea.hbm %s2817_s1, 128  ;;  %p2483_p13 = scmp.lt.u32.totalorder %s2817_s1, %s3182_s21 }
  0x5d   : > { %p2478_p12 = scmp.ne.s32.totalorder %s2817_s1, %s2477_s7  ;;  %p2484_p6 = scmp.lt.u32.totalorder %s2482_s16, %s2477_s7 }
  0x5e   : > { %p2486_p3 = scmp.lt.u32.totalorder %s2477_s7, %s2817_s1 }
  0x5f   : > { %p2480_p2 = pnand %p2479_p0, %p2478_p12  ;;  %p2485_p10 = por %p2484_p6, %p2483_p13 }
  0x61   : > { %p2481_p1 = pneg %p2480_p2  ;;  %p2487_p7 = por %p2486_p3, %p2485_p10 }
  0x63   : > { %p2488_p9 = pnand %p2487_p7, %p2481_p1 }
  0x65   : > { %2491 = shalt.err (!%p2488_p9)
}
  0x66   : > { %s2492_s29 = scalar_lea.vmem %s2819_s14, 128  ;;  %s2583_s22 = smov [#allocation3]  }
  0x67   : > { %p2493_p12 = scmp.ne.s32.totalorder %s2819_s14, %s2492_s29  ;;  %s2497_s19 = sshll.u32 %s2583_s22, 4  ;;  %s2498_s19 = int_to_ptr.vmem [resolvable:$false] %s2497_s19 }
  0x68   : > { %s2499_s17 = scalar_lea.vmem %s2498_s19, 256  ;;  %p2500_p4 = scmp.lt.s32.totalorder %s2819_s14, %s2498_s19 }
  0x69   : > { %p2495_p2 = pnand %p2493_p12, %p2479_p0  ;;  %p2501_p13 = scmp.lt.s32.totalorder %s2499_s17, %s2492_s29 }
  0x6b   : > { %p2496_p5 = pneg %p2495_p2  ;;  %p2502_p6 = por %p2501_p13, %p2500_p4 }
  0x6d   : > { %p2503_p10 = pnand %p2502_p6, %p2496_p5 }
  0x6f   : > { %2506 = shalt.err (!%p2503_p10)
}
  0x70   : > { %2345 = dma.hbm_to_vmem [thread:$0]  (!%p2821_p11), %s2817_s1, 128, %s2819_s14, %s509_s24  }
  0x71   : > { %528 = sbr.rel (%p2724_p8) target bundleno = 2453 (0x995), region = 88  ;;  %s2853_s7 = sand.u32 (!%p2724_p8), 1, %s2569_s25  }
  0x72   : > { %s2039_s16 = sshll.u32 (!%p2724_p8), %s2853_s7, 3  ;;  %s531_s12 = scalar_lea.sflag (!%p2724_p8), [#allocation4], %s2853_s7 }
  0x73   : > { %s2859_s29 = scalar_lea.vmem (!%p2724_p8), [#allocation3], %s2039_s16  ;;  %p3184_p4 = scmp.ne.s32.totalorder (!%p2724_p8), %s3174_s0, 0 }
  0x78   : > { %2552 = dma.done.wait (%p3184_p4), %s531_s12, 128  }
  0x79   : > { %2554 = vsyncadd (%p3184_p4), %s531_s12, 4294967168  ;;  %p3185_p5 = scmp.eq.s32.totalorder %s2705_s28, 0 }
  0x7b   : > { %2556 = dma.done.wait (%p3185_p5), [#allocation7], 1024   ;;  %p3186_p8 = pmov %p3185_p5 }
  0x7c   : > { %v2584_v0 = vmov 0.0|0.0   ;;  %vm2585_vm0 = vmmov 0   ;;  %v2586_v1 = vmov 0.0   ;;  %vm605_vm1 = vcmask 261120   ;;  %s3189_s1 = sld [smem:[#allocation16_spill]]  ;;  %s3190_s3 = sld [smem:[#allocation18_spill]] }
  0x7d   : > { %2558 = vsyncadd (%p3186_p8), [#allocation7], 4294966272  ;;  %2267 = vmatprep.subr.bf16.mxu0 %v2584_v0  ;;  %2275 = vmatprep.subr.bf16.mxu1 %v2584_v0  ;;  %v2918_v15 = vld [vmem:[%s2859_s29] sm:$0xff]  ;;  %v784_v16 = vld [vmem:[%s3141_s5] sm:$0xff]  ;;  %s3191_s2 = sld [smem:[#allocation17_spill]]  ;;  %vm878_vm3 = vcmask 64512  }
  0x7e   : > { %2161 = vmatprep.mubr.msk.f32.mxu0 %vm2585_vm0, %v2586_v1  ;;  %2172 = vmatprep.mubr.msk.f32.mxu1 %vm2585_vm0, %v2586_v1  ;;  %vm2877_vm2 = vmpackc.low %vm605_vm1, %vm605_vm1  ;;  %v785_v17 = vld [vmem:[%s3141_s5 + $0x8] sm:$0xff]  ;;  %v786_v19 = vld [vmem:[%s3141_s5 + $0x10] sm:$0xff]  ;;  %s2587_s0 = smov 120   ;;  %s2588_s18 = smov 112   ;;  %vm1210_vm4 = vcmask 130112   ;;  %vm1381_vm5 = vcmask 195712  }
  0x7f   : > { %v2284_v18 = vpack.c.bf16 %v785_v17, %v784_v16  ;;  %v787_v20 = vld [vmem:[%s3141_s5 + $0x18] sm:$0xff]  ;;  %v2049_v23 = vld [vmem:[%s3140_s4] ss:$0 sm:$0xff]  ;;  %s2589_s29 = smov 104   ;;  %s2590_s24 = smov 8   ;;  %vm1552_vm6 = vcmask 261312  }
  0x80   : > { %v2288_v21 = vpack.c.bf16 %v787_v20, %v786_v19  ;;  %v2055_v32 = vld [vmem:[%s3142_s6] ss:$0 sm:$0xff]  ;;  %s2591_s22 = smov 16   ;;  %s2592_s19 = smov 24   ;;  %vm1809_vm7 = vcmask 523264  }
  0x81   : > { %vm2317_vm8 = vmpackc.low %vm1809_vm7, %vm1809_vm7  ;;  %s3194_s17 = sld [smem:[#allocation22_spill]]  ;;  %s592_s14 = scalar_lea.vmem [#allocation9], %s2039_s16 }
  0x82   : > { %v594_v3 = vld [vmem:[%s3189_s1] sm:$0xff]  ;;  %v595_v4 = vld [vmem:[%s3189_s1 + $0x8] sm:$0xff]  ;;  %v596_v9 = vld [vmem:[%s3189_s1 + $0x10] sm:$0xff]  ;;  %s1942_s20 = sshll.u32 %s592_s14, 4  ;;  %p3197_p0 = scmp.ne.s32.totalorder %s3181_s30, 0  ;;  %s3093_s20 = int_to_ptr.vmem [resolvable:$true] %s1942_s20 }
  0x83   : > { %v691_v5 = vld [vmem:[%s3190_s3] sm:$0xff]  ;;  %v2268_v6 = vpack.c.bf16 %v595_v4, %v594_v3  ;;  %v692_v7 = vld [vmem:[%s3190_s3 + $0x8] sm:$0xff]  ;;  %v597_v10 = vld [vmem:[%s3189_s1 + $0x18] sm:$0xff] }
  0x84   : > { %v2276_v8 = vpack.c.bf16 %v692_v7, %v691_v5  ;;  %v693_v11 = vld [vmem:[%s3190_s3 + $0x10] sm:$0xff]  ;;  %v694_v12 = vld [vmem:[%s3190_s3 + $0x18] sm:$0xff]  ;;  %v2272_v13 = vpack.c.bf16 %v597_v10, %v596_v9  ;;  %v2043_v22 = vld [vmem:[%s3191_s2] ss:$0 sm:$0xff]  ;;  %s3196_s2 = sld [smem:[#allocation24_spill]] }
  0x85   : > { %2270 = vmatpush3.bf16.xpose.msk.msra.mxu0 %vm2877_vm2, %v2268_v6  ;;  %v2280_v14 = vpack.c.bf16 %v694_v12, %v693_v11 }
  0x86   : > { %2278 = vmatpush3.bf16.xpose.msk.msra.mxu1 %vm2877_vm2, %v2276_v8  ;;  %2271 = vmatprep.subr.bf16.mxu0 %v2584_v0 }
  0x87   : > { %2279 = vmatprep.subr.bf16.mxu1 %v2584_v0 }
  0x8d   : > { %2274 = vmatpush3.bf16.xpose.msk.msra.mxu0 %vm2877_vm2, %v2272_v13 }
  0x8e   : > { %2282 = vmatpush3.bf16.xpose.msk.msra.mxu1 %vm2877_vm2, %v2280_v14  ;;  %2283 = vmatprep.subr.bf16.mxu0 %v2584_v0 }
  0x8f   : > { %2186 = vmatprep.subr.mxu1 %v2586_v1 }
  0x94   : > { %2162 = vmatmul.mubr.msk.f32.vlgmr.msra.gmra.mrb[0].mxu0 %vm605_vm1, %v2918_v15 }
  0x95   : > { %2173 = vmatmul.mubr.msk.f32.vlgmr.msra.gmra.mrb[0].mxu1 %vm605_vm1, %v2918_v15  ;;  %2183 = vmatprep.mubr.msk.f32.mxu0 %vm2585_vm0, %v2586_v1 }
  0x96   : > { %2188 = vmatprep.mubr.msk.f32.mxu1 %vm2585_vm0, %v2586_v1  ;;  %2286 = vmatpush3.bf16.xpose.msk.msra.mxu0 %vm2877_vm2, %v2284_v18 }
  0x97   : > { %2287 = vmatprep.subr.bf16.mxu0 %v2584_v0 }
  0x9e   : > { %2290 = vmatpush3.bf16.xpose.msk.msra.mxu0 %vm2877_vm2, %v2288_v21 }
  0x9f   : > { %2206 = vmatprep.subr.mxu0 %v2586_v1 }
  0xa5   : > { %2184 = vmatmul.mubr.msk.f32.vlgmr.msra.gmra.mrb[2].mxu0 %vm605_vm1, %v2918_v15 }
  0xa6   : > { %2208 = vmatprep.mubr.msk.f32.mxu0 %vm2585_vm0, %v2586_v1 }
 0x167   : > { %v687_v24 = vpop.f32.mrb[0].mxu0 }
 0x168   : > { %v688_v25 = vadd.f32 %v2043_v22, %v687_v24  ;;  %v780_v26 = vpop.f32.mrb[0].mxu1  ;;  %v2163_v27 = vpop.f32.mrb[1].mxu0  ;;  %v1556_v24 = vld [vmem:[#allocation6 + $0x8] sm:$0xff] }
 0x169   : > { %v781_v28 = vadd.f32 %v2049_v23, %v780_v26  ;;  %v2174_v29 = vpop.f32.mrb[1].mxu1  ;;  %v1555_v23 = vld [vmem:[#allocation6] sm:$0xff]  ;;  %v1557_v27 = vld [vmem:[#allocation6 + $0x10] sm:$0xff] }
 0x16a   : > { %v877_v30 = vmul.f32 0.35355338, %v688_v25  ;;  %v2292_v25 = vpack.c.bf16 %v1556_v24, %v1555_v23 }
 0x16b   : > { %2187 = vmatpush3.xpose.msk.msra.mxu1 %vm878_vm3, %v781_v28 }
 0x16c   : > { %1040 = vrot.lane.b32.xlu1 %v877_v30, %s2587_s0  ;;  %2191 = vmatprep.subr.mxu1 %v2586_v1 }
 0x16e   : > { %2189 = vmatmul.mubr.msk.f32.vlgmr.msra.gmra.mrb[2].mxu1 %vm878_vm3, %v877_v30 }
 0x16f   : > { %2193 = vmatprep.mubr.msk.f32.mxu1 %vm2585_vm0, %v2586_v1 }
 0x170   : > { %1214 = vrot.lane.b32.xlu1 %v781_v28, %s2588_s18 }
 0x174   : > { %1212 = vrot.lane.b32.xlu1 %v877_v30, %s2588_s18 }
 0x178   : > { %1385 = vrot.lane.b32.xlu1 %v781_v28, %s2589_s29  ;;  %v873_v33 = vpop.f32.mrb[2].mxu0 }
 0x179   : > { %v874_v35 = vadd.f32 %v2055_v32, %v873_v33  ;;  %v2185_v36 = vpop.f32.mrb[3].mxu0 }
 0x17b   : > { %2192 = vmatpush3.msra.mxu1 %v874_v35 }
 0x17c   : > { %1383 = vrot.lane.b32.xlu1 %v877_v30, %s2589_s29  ;;  %2196 = vmatprep.subr.mxu1 %v2586_v1 }
 0x180   : > { %1300 = vrot.lane.b32.xlu1 %v874_v35, %s2588_s18  ;;  %s3195_s18 = sld [smem:[#allocation23_spill]] }
 0x1de   : > { %v1041_v31 = vpop.permute.xlu1 %1040 }
 0x1e2   : > { %v1215_v34 = vpop.permute.xlu1 %1214 }
 0x1e3   : > { %2207 = vmatpush3.xpose.msk.msra.mxu0 %vm878_vm3, %v1215_v34 }
 0x1e4   : > { %2216 = vmatprep.subr.mxu0 %v2586_v1 }
 0x1e6   : > { %v1213_v37 = vpop.permute.xlu1 %1212 }
 0x1e7   : > { %2209 = vmatmul.mubr.msk.f32.vlgmr.msra.gmra.mrb[4].mxu0 %vm878_vm3, %v1213_v37 }
 0x1e8   : > { %2218 = vmatprep.mubr.msk.f32.mxu0 %vm2585_vm0, %v2586_v1 }
 0x1ea   : > { %v1386_v38 = vpop.permute.xlu1 %1385 }
 0x1eb   : > { %2217 = vmatpush3.xpose.msk.msra.mxu0 %vm878_vm3, %v1386_v38 }
 0x1ec   : > { %2291 = vmatprep.subr.bf16.mxu0 %v2584_v0 }
 0x1ee   : > { %v1384_v39 = vpop.permute.xlu1 %1383 }
 0x1ef   : > { %2219 = vmatmul.mubr.msk.f32.vlgmr.msra.gmra.mrb[6].mxu0 %vm878_vm3, %v1384_v39 }
 0x1f0   : > { %2234 = vmatprep.mubr.msk.f32.mxu0 %vm2585_vm0, %v2586_v1  ;;  %2294 = vmatpush3.bf16.xpose.msk.msra.mxu0 %vm2877_vm2, %v2292_v25 }
 0x1f1   : > { %2295 = vmatprep.subr.bf16.mxu0 %v2584_v0 }
 0x1f2   : > { %v1301_v4 = vpop.permute.xlu1 %1300 }
 0x241   : > { %v951_v40 = vpop.f32.mrb[2].mxu1 }
 0x242   : > { %v2190_v41 = vpop.f32.mrb[3].mxu1  ;;  %v955_v42 = vsel %vm878_vm3, %v951_v40, -inf }
 0x243   : > { %956 = vmax.xlane.f32.xlu0 %v955_v42 }
 0x259   : > { %1042 = vrot.lane.b32.xlu0 %v781_v28, %s2587_s0  ;;  %v1558_v28 = vld [vmem:[#allocation6 + $0x18] sm:$0xff] }
 0x25a   : > { %v2296_v29 = vpack.c.bf16 %v1558_v28, %v1557_v27 }
 0x25c   : > { %2298 = vmatpush3.bf16.xpose.msk.msra.mxu0 %vm2877_vm2, %v2296_v29 }
 0x25d   : > { %2315 = vmatprep.subr.bf16.mxu0 %v2584_v0 }
 0x2ba   : > { %v1286_v43 = vpop.f32.mrb[4].mxu0 }
 0x2bb   : > { %v2210_v44 = vpop.f32.mrb[5].mxu0  ;;  %v1290_v45 = vsel %vm878_vm3, %v1286_v43, -inf }
 0x2bc   : > { %1291 = vmax.xlane.f32.xlu0 %v1290_v45 }
 0x2c2   : > { %v1457_v46 = vpop.f32.mrb[6].mxu0 }
 0x2c3   : > { %v2220_v47 = vpop.f32.mrb[7].mxu0  ;;  %v1461_v48 = vsel %vm878_vm3, %v1457_v46, -inf }
 0x2c4   : > { %1462 = vmax.xlane.f32.xlu1 %v1461_v48  ;;  %v1686_v47 = vld [vmem:[%s3147_s11 + $0x8] sm:$0xff] }
 0x2d0   : > { %v957_v49 = vpop.xlane.xlu0 %956 }
 0x2d1   : > { %v958_v50 = vsub.f32 %v951_v40, %v957_v49  ;;  %v2073_v49 = vld [vmem:[%s3144_s8] ss:$0 sm:$0xff] }
 0x2d2   : > { %1129 = vrot.lane.b32.xlu0 %v874_v35, %s2587_s0 }
 0x2d3   : > { %v959_v51 = vmul.f32 1.442695, %v958_v50 }
 0x2d4   : > { %v1043_v53 = vpop.permute.xlu0 %1042 }
 0x2d5   : > { %2401 = vpow2.f32 %v959_v51 }
 0x2df   : > { %v2402_v52 = vpop.eup %2401 }
 0x2e0   : > { %2194 = vmatmul.mubr.msk.f32.vlgmr.msra.gmra.mrb[4].mxu1 %vm878_vm3, %v2402_v52  ;;  %v961_v17 = vsel %vm878_vm3, %v2402_v52, 0.0 }
 0x2e1   : > { %2197 = vmatpush3.xpose.msk.msra.mxu1 %vm878_vm3, %v1043_v53  ;;  %2198 = vmatprep.mubr.msk.f32.mxu1 %vm2585_vm0, %v2586_v1 }
 0x2e2   : > { %2201 = vmatprep.subr.mxu1 %v2586_v1 }
 0x2e4   : > { %2199 = vmatmul.mubr.msk.f32.vlgmr.msra.gmra.mrb[6].mxu1 %vm878_vm3, %v1041_v31 }
 0x2e5   : > { %2203 = vmatprep.mubr.msk.f32.mxu1 %vm2585_vm0, %v2586_v1 }
 0x349   : > { %v1292_v54 = vpop.xlane.xlu0 %1291 }
 0x34a   : > { %v1293_v55 = vsub.f32 %v1286_v43, %v1292_v54 }
 0x34c   : > { %v1294_v62 = vmul.f32 1.442695, %v1293_v55 }
 0x34d   : > { %v1130_v56 = vpop.permute.xlu0 %1129 }
 0x34e   : > { %2202 = vmatpush3.msra.mxu1 %v1130_v56  ;;  %2403 = vpow2.f32 %v1294_v62  ;;  %v1687_v56 = vld [vmem:[%s3147_s11 + $0x10] sm:$0xff]  ;;  %v1692_v62 = vld [vmem:[%s3147_s11 + $0x38] sm:$0xff] }
 0x34f   : > { %2211 = vmatprep.subr.mxu1 %v2586_v1 }
 0x351   : > { %v1463_v5 = vpop.xlane.xlu1 %1462 }
 0x352   : > { %v1464_v6 = vsub.f32 %v1457_v46, %v1463_v5  ;;  %v1685_v46 = vld [vmem:[%s3147_s11] sm:$0xff] }
 0x353   : > { %v2300_v48 = vpack.c.bf16 %v1686_v47, %v1685_v46  ;;  %v2098_v46 = vld [vmem:[%s3195_s18] ss:$0 sm:$0xff] }
 0x354   : > { %v1465_v9 = vmul.f32 1.442695, %v1464_v6  ;;  %v1800_v6 = vld [vmem:[#allocation8 + $0x10] sm:$0xff] }
 0x358   : > { %v2404_v63 = vpop.eup %2403 }
 0x359   : > { %v1296_v3 = vsel %vm878_vm3, %v2404_v63, 0.0 }
 0x3b3   : > { %v1034_v57 = vpop.f32.mrb[4].mxu1 }
 0x3b4   : > { %v2195_v58 = vpop.f32.mrb[5].mxu1 }
 0x3b7   : > { %v1114_v59 = vpop.f32.mrb[6].mxu1 }
 0x3b8   : > { %v2200_v60 = vpop.f32.mrb[7].mxu1  ;;  %v1118_v61 = vsel %vm878_vm3, %v1114_v59, -inf }
 0x3b9   : > { %1119 = vmax.xlane.f32.xlu1 %v1118_v61  ;;  %v1691_v61 = vld [vmem:[%s3147_s11 + $0x30] sm:$0xff] }
 0x3ca   : > { %1471 = vrot.lane.b32.xlu1 %v874_v35, %s2589_s29  ;;  %s3192_s29 = sld [smem:[#allocation20_spill]] }
 0x3ee   : > { %1297 = vadd.xlane.f32.xlu1 %v1296_v3  ;;  %v1798_v3 = vld [vmem:[#allocation8] sm:$0xff] }
 0x446   : > { %v1120_v7 = vpop.xlane.xlu1 %1119 }
 0x447   : > { %v1121_v8 = vsub.f32 %v1114_v59, %v1120_v7  ;;  %v1690_v59 = vld [vmem:[%s3147_s11 + $0x28] sm:$0xff]  ;;  %v1801_v7 = vld [vmem:[#allocation8 + $0x18] sm:$0xff] }
 0x449   : > { %v1122_v10 = vmul.f32 1.442695, %v1121_v8  ;;  %v2320_v8 = vpack.c.bf16 %v1801_v7, %v1800_v6 }
 0x44a   : > { %v1472_v14 = vpop.permute.xlu1 %1471 }
 0x44b   : > { %2405 = vpow2.f32 %v1122_v10 }
 0x44c   : > { %2407 = vpow2.f32 %v1465_v9 }
 0x455   : > { %v2406_v11 = vpop.eup %2405 }
 0x456   : > { %2204 = vmatmul.mubr.msk.f32.vlgmr.msra.gmra.mrb[8].mxu1 %vm878_vm3, %v2406_v11  ;;  %v1124_v12 = vsel %vm878_vm3, %v2406_v11, 0.0  ;;  %v2408_v13 = vpop.eup %2407 }
 0x457   : > { %2212 = vmatpush3.msra.mxu1 %v1301_v4  ;;  %1125 = vadd.xlane.f32.xlu0 %v1124_v12  ;;  %v1467_v16 = vsel %vm878_vm3, %v2408_v13, 0.0  ;;  %v1799_v4 = vld [vmem:[#allocation8 + $0x8] sm:$0xff] }
 0x458   : > { %2213 = vmatprep.mubr.msk.f32.mxu1 %vm2585_vm0, %v2586_v1  ;;  %2221 = vmatprep.subr.mxu1 %v2586_v1  ;;  %v2316_v5 = vpack.c.bf16 %v1799_v4, %v1798_v3 }
 0x45a   : > { %2214 = vmatmul.mubr.msk.f32.vlgmr.msra.gmra.mrb[10].mxu1 %vm878_vm3, %v2404_v63  ;;  %v2312_v63 = vpack.c.bf16 %v1692_v62, %v1691_v61 }
 0x45b   : > { %2222 = vmatpush3.msra.mxu1 %v1472_v14  ;;  %1468 = vadd.xlane.f32.xlu0 %v1467_v16 }
 0x45c   : > { %2223 = vmatprep.mubr.msk.f32.mxu1 %vm2585_vm0, %v2586_v1  ;;  %2299 = vmatprep.subr.bf16.mxu1 %v2584_v0 }
 0x45e   : > { %2224 = vmatmul.mubr.msk.f32.vlgmr.msra.gmra.mrb[12].mxu1 %vm878_vm3, %v2408_v13 }
 0x45f   : > { %962 = vadd.xlane.f32.xlu0 %v961_v17  ;;  %2253 = vmatprep.mubr.msk.f32.mxu1 %vm2585_vm0, %v2586_v1 }
 0x462   : > { %2302 = vmatpush3.bf16.xpose.msk.msra.mxu1 %vm2877_vm2, %v2300_v48 }
 0x463   : > { %2303 = vmatprep.subr.bf16.mxu1 %v2584_v0 }
 0x47b   : > { %v1298_v26 = vpop.xlane.xlu1 %1297 }
 0x4e4   : > { %v1126_v18 = vpop.xlane.xlu0 %1125 }
 0x4e8   : > { %v1469_v19 = vpop.xlane.xlu0 %1468 }
 0x4ec   : > { %v963_v20 = vpop.xlane.xlu0 %962 }
 0x4ed   : > { %2409 = vrcp.f32 %v963_v20 }
 0x4ee   : > { %2411 = vrcp.f32 %v1126_v18  ;;  %v2079_v18 = vld [vmem:[%s3145_s9] ss:$0 sm:$0xff] }
 0x4ef   : > { %2413 = vrcp.f32 %v1298_v26 }
 0x4f0   : > { %2415 = vrcp.f32 %v1469_v19 }
 0x4f7   : > { %v2410_v21 = vpop.eup %2409 }
 0x4f8   : > { %v1038_v22 = vmul.f32 %v2410_v21, %v1034_v57  ;;  %v2412_v30 = vpop.eup %2411  ;;  %v1688_v57 = vld [vmem:[%s3147_s11 + $0x18] sm:$0xff] }
 0x4f9   : > { %v2414_v34 = vpop.eup %2413  ;;  %v2304_v58 = vpack.c.bf16 %v1688_v57, %v1687_v56 }
 0x4fa   : > { %1039 = vst.msk [vmem:[#allocation2] sm:$0xff] %vm878_vm3, %v1038_v22  ;;  %v2416_v38 = vpop.eup %2415  ;;  %v2081_v22 = vld [vmem:[%s3192_s29] ss:$0 sm:$0xff]  ;;  %s2100_s29 = sshll.u32 %s2705_s28, 7  ;;  %s2593_s28 = smov [#allocation9]  }
 0x4fb   : > { %2306 = vmatpush3.bf16.xpose.msk.msra.mxu1 %vm2877_vm2, %v2304_v58  ;;  %s3091_s3 = scalar_lea.hbm %s3196_s2, %s2100_s29  ;;  %s2511_s16 = sshll.u32 %s2593_s28, 4  ;;  %s2512_s16 = int_to_ptr.vmem [resolvable:$false] %s2511_s16 }
 0x4fc   : > { %2307 = vmatprep.subr.bf16.mxu1 %v2584_v0  ;;  %p2514_p7 = scmp.lt.s32.totalorder %s3093_s20, %s2512_s16 }
 0x529   : > { %v1201_v31 = vpop.f32.mrb[8].mxu1 }
 0x52a   : > { %v1205_v32 = vmul.f32 %v2412_v30, %v1201_v31  ;;  %v2205_v33 = vpop.f32.mrb[9].mxu1 }
 0x52c   : > { %1207 = vrot.lane.b32.xlu1 %v1205_v32, %s2590_s24  ;;  %s3193_s24 = sld [smem:[#allocation21_spill]] }
 0x52d   : > { %v1372_v35 = vpop.f32.mrb[10].mxu1 }
 0x52e   : > { %v1376_v36 = vmul.f32 %v2414_v34, %v1372_v35  ;;  %v2215_v37 = vpop.f32.mrb[11].mxu1 }
 0x530   : > { %1378 = vrot.lane.b32.xlu0 %v1376_v36, %s2591_s22  ;;  %s1929_s22 = scalar_lea.sflag [#allocation5], %s2853_s7 }
 0x531   : > { %v1543_v39 = vpop.f32.mrb[12].mxu1 }
 0x532   : > { %v1547_v40 = vmul.f32 %v2416_v38, %v1543_v39  ;;  %v2225_v41 = vpop.f32.mrb[13].mxu1  ;;  %v2091_v27 = vld [vmem:[%s3193_s24] ss:$0 sm:$0xff] }
 0x534   : > { %1549 = vrot.lane.b32.xlu1 %v1547_v40, %s2592_s19  ;;  %s2507_s19 = scalar_lea.vmem %s3093_s20, 128 }
 0x535   : > { %p2508_p11 = scmp.ne.s32.totalorder %s3093_s20, %s2507_s19 }
 0x537   : > { %p2509_p1 = pnand %p2508_p11, %p3197_p0 }
 0x539   : > { %p2510_p3 = pneg %p2509_p1 }
 0x59e   : > { %v1208_v42 = vpop.permute.xlu1 %1207 }
 0x59f   : > { %1211 = vst.msk [vmem:[#allocation2] sm:$0xff] %vm1210_vm4, %v1208_v42 }
 0x5a2   : > { %v1379_v43 = vpop.permute.xlu0 %1378 }
 0x5a3   : > { %1382 = vst.msk [vmem:[#allocation2] sm:$0xff] %vm1381_vm5, %v1379_v43 }
 0x5a6   : > { %v1550_v44 = vpop.permute.xlu1 %1549 }
 0x5a7   : > { %1553 = vst.msk [vmem:[#allocation2] sm:$0xff] %vm1552_vm6, %v1550_v44  ;;  %v2097_v44 = vld [vmem:[%s3194_s17] ss:$0 sm:$0xff]  ;;  %s2513_s17 = scalar_lea.vmem %s2512_s16, 256 }
 0x5a8   : > { %p2515_p9 = scmp.lt.s32.totalorder %s2513_s17, %s2507_s19 }
 0x5aa   : > { %p2516_p12 = por %p2515_p9, %p2514_p7 }
 0x5ac   : > { %p2517_p2 = pnand %p2516_p12, %p2510_p3 }
 0x5ae   : > { %v1554_v45 = vld [vmem:[#allocation2] sm:$0xff] }
 0x5af   : > { %2235 = vmatmul.mubr.msk.f32.vlgmr.msra.gmra.mrb[8].mxu0 %vm605_vm1, %v1554_v45 }
 0x5b0   : > { %2264 = vmatprep.mubr.msk.f32.mxu0 %vm2585_vm0, %v2586_v1  ;;  %2318 = vmatpush3.bf16.xpose.msk.msra.mxu0 %vm2317_vm8, %v2316_v5 }
 0x5b1   : > { %2319 = vmatprep.subr.bf16.mxu0 %v2584_v0 }
 0x5b8   : > { %2322 = vmatpush3.bf16.xpose.msk.msra.mxu0 %vm2317_vm8, %v2320_v8 }
 0x682   : > { %v1647_v50 = vpop.f32.mrb[8].mxu0 }
 0x683   : > { %v1648_v1 = vadd.f32 %v2073_v49, %v1647_v50  ;;  %v2236_v51 = vpop.f32.mrb[9].mxu0 }
 0x685   : > { %v1652_v52 = vadd.f32 %v1648_v1, %v2918_v15  ;;  %v1689_v15 = vld [vmem:[%s3147_s11 + $0x20] sm:$0xff] }
 0x686   : > { %v2308_v60 = vpack.c.bf16 %v1690_v59, %v1689_v15 }
 0x687   : > { %v1655_v53 = vsel %vm605_vm1, %v1652_v52, 0.0  ;;  %v1660_v54 = vmul.f32 %v1652_v52, %v1652_v52 }
 0x688   : > { %1656 = vadd.xlane.f32.xlu1 %v1655_v53  ;;  %2310 = vmatpush3.bf16.xpose.msk.msra.mxu1 %vm2877_vm2, %v2308_v60 }
 0x689   : > { %v1661_v55 = vsel %vm605_vm1, %v1660_v54, 0.0  ;;  %2311 = vmatprep.subr.bf16.mxu1 %v2584_v0  ;;  %v2080_v0 = vld [vmem:[%s3146_s10] ss:$0 sm:$0xff] }
 0x68a   : > { %1662 = vadd.xlane.f32.xlu0 %v1661_v55 }
 0x690   : > { %2314 = vmatpush3.bf16.xpose.msk.msra.mxu1 %vm2877_vm2, %v2312_v63 }
 0x715   : > { %v1657_v9 = vpop.xlane.xlu1 %1656 }
 0x716   : > { %v1659_v10 = vmul.f32 0.03125, %v1657_v9 }
 0x717   : > { %v1663_v11 = vpop.xlane.xlu0 %1662 }
 0x718   : > { %v1665_v12 = vmul.f32 %v1659_v10, %v1659_v10  ;;  %v1664_v2 = vmul.f32 0.03125, %v1663_v11  ;;  %v1667_v16 = vsub.f32 %v1652_v52, %v1659_v10 }
 0x71a   : > { %v1666_v13 = vsub.f32 %v1664_v2, %v1665_v12 }
 0x71c   : > { %v1668_v14 = vadd.f32 1e-05, %v1666_v13 }
 0x71e   : > { %2417 = vrsqrt.f32 %v1668_v14 }
 0x728   : > { %v2418_v17 = vpop.eup %2417 }
 0x729   : > { %v1670_v19 = vmul.f32 %v2418_v17, %v1667_v16 }
 0x72b   : > { %v1677_v20 = vmul.f32 %v2079_v18, %v1670_v19 }
 0x72d   : > { %v1684_v21 = vadd.f32 %v2080_v0, %v1677_v20 }
 0x72f   : > { %2254 = vmatmul.mubr.msk.f32.vlgmr.msra.gmra.mrb[14].mxu1 %vm605_vm1, %v1684_v21 }
 0x802   : > { %v1793_v23 = vpop.f32.mrb[14].mxu1 }
 0x803   : > { %v1794_v24 = vadd.f32 %v2081_v22, %v1793_v23  ;;  %v2255_v25 = vpop.f32.mrb[15].mxu1 }
 0x805   : > { %v1797_v26 = vmax.f32 %v1794_v24, 0.0 }
 0x807   : > { %2265 = vmatmul.mubr.msk.f32.vlgmr.msra.gmra.mrb[10].mxu0 %vm1809_vm7, %v1797_v26 }
 0x8da   : > { %v1891_v28 = vpop.f32.mrb[10].mxu0 }
 0x8db   : > { %v1892_v29 = vadd.f32 %v2091_v27, %v1891_v28  ;;  %v2266_v30 = vpop.f32.mrb[11].mxu0 }
 0x8dd   : > { %v1895_v31 = vadd.f32 %v1892_v29, %v1684_v21 }
 0x8df   : > { %v1898_v32 = vsel %vm605_vm1, %v1895_v31, 0.0  ;;  %v1902_v33 = vmul.f32 %v1895_v31, %v1895_v31 }
 0x8e0   : > { %1899 = vadd.xlane.f32.xlu0 %v1898_v32 }
 0x8e1   : > { %v1903_v34 = vsel %vm605_vm1, %v1902_v33, 0.0 }
 0x8e2   : > { %1904 = vadd.xlane.f32.xlu1 %v1903_v34 }
 0x96d   : > { %v1900_v35 = vpop.xlane.xlu0 %1899 }
 0x96e   : > { %v1901_v36 = vmul.f32 0.03125, %v1900_v35 }
 0x96f   : > { %v1905_v37 = vpop.xlane.xlu1 %1904 }
 0x970   : > { %v1907_v38 = vmul.f32 %v1901_v36, %v1901_v36  ;;  %v1906_v39 = vmul.f32 0.03125, %v1905_v37  ;;  %v1909_v42 = vsub.f32 %v1895_v31, %v1901_v36 }
 0x972   : > { %v1908_v40 = vsub.f32 %v1906_v39, %v1907_v38 }
 0x974   : > { %v1910_v41 = vadd.f32 1e-05, %v1908_v40 }
 0x976   : > { %2419 = vrsqrt.f32 %v1910_v41 }
 0x980   : > { %v2420_v43 = vpop.eup %2419 }
 0x981   : > { %v1912_v45 = vmul.f32 %v2420_v43, %v1909_v42 }
 0x983   : > { %v1919_v47 = vmul.f32 %v2097_v44, %v1912_v45 }
 0x985   : > { %v1926_v48 = vadd.f32 %v2098_v46, %v1919_v47 }
 0x987   : > { %1927 = vst.msk [vmem:[%s592_s14] sm:$0xff] %vm605_vm1, %v1926_v48 }
 0x988   : > { %2520 = shalt.err (!%p2517_p2)
}
 0x989   : > { %s2521_s7 = scalar_lea.hbm %s3091_s3, 128  ;;  %s2525_s0 = scalar_lea.hbm %s3196_s2, 256 }
 0x98a   : > { %p2522_p13 = scmp.ne.s32.totalorder %s3091_s3, %s2521_s7  ;;  %p2526_p4 = scmp.lt.u32.totalorder %s3091_s3, %s3196_s2 }
 0x98b   : > { %p2527_p5 = scmp.lt.u32.totalorder %s2525_s0, %s2521_s7  ;;  %p2529_p11 = scmp.lt.u32.totalorder %s2521_s7, %s3091_s3 }
 0x98c   : > { %p2523_p6 = pnand %p2522_p13, %p3197_p0 }
 0x98d   : > { %p2528_p8 = por %p2527_p5, %p2526_p4 }
 0x98e   : > { %p2524_p10 = pneg %p2523_p6 }
 0x98f   : > { %p2530_p1 = por %p2529_p11, %p2528_p8 }
 0x991   : > { %p2531_p3 = pnand %p2530_p1, %p2524_p10 }
 0x993   : > { %2534 = shalt.err (!%p2531_p3)
}
 0x994   : > { %2333 = dma.vmem_to_hbm [thread:$0]  (%p3197_p0), %s3093_s20, 128, %s3091_s3, %s1929_s22  }
 0x995 PF: > { %s3198_s14 = sld [smem:[#allocation13_spill]]  ;;  %s3199_s24 = sld [smem:[#allocation14_spill]] }
 0x996   : > { %p3201_p9 = scmp.ge.s32.totalorder %s2577_s27, 2 }
 0x99b   : > { %s1954_s19 = sand.u32 1, %s3198_s14   ;;  %p3200_p7 = scmp.ne.s32.totalorder %s3199_s24, 0 }
 0x99c   : > { %s1955_s28 = scalar_lea.sflag [#allocation5], %s1954_s19 }
 0x99d   : > { %p2347_p12 = pnand %p3201_p9, %p3200_p7 }
 0x99f   : > { %2560 = dma.done.wait (!%p2347_p12), %s1955_s28, 128  }
 0x9a0   : > { %2562 = vsyncadd (!%p2347_p12), %s1955_s28, 4294967168  ;;  %p31_p2 = scmp.ge.s32.totalorder %s2794_s15, 4   ;;  %s3202_s24 = smov %s2569_s25 }
 0x9a1   : > { %s3203_s25 = smov %s2573_s26  ;;  %s3204_s26 = smov %s2810_s23 }
 0x9a2   : > { %s3205_s27 = smov %s2794_s15  ;;  %33 = sbr.rel (!%p31_p2) target bundleno = 17 (0x11), region = 141 }
 0x9a9   :  { %1960 = vsyncpa [#allocation4], 1 }
 0x9aa   :  { %1962 = vsyncpa [#allocation4 + $0x1], 1 }
 0x9ab   :  { %1963 = vsyncpa [#allocation7], 1 }
 0x9ac   :  { %1964 = vsyncpa [#allocation5], 1 }
 0x9ad   :  { %1966 = vsyncpa [#allocation5 + $0x1], 1 }

// kernel: tpu_custom_call.1
= control target key start
LH: loop header
LB: loop body
LE: loop exit
PB: predicated region body
PF: predicated region fallthrough
CT: control target
= control target key end

     0   :  { %s3136_s0 = inlined_call_operand.hbm [shape: f32[2,8,32], index: 0, kind: input, shape index: {}]   ;;  %s3137_s1 = inlined_call_operand.vmem [shape: f32[32,32], index: 1, kind: input, shape index: {}]   ;;  %s3138_s2 = inlined_call_operand.vmem [shape: f32[1,32], index: 2, kind: input, shape index: {}]   ;;  %s3139_s3 = inlined_call_operand.vmem [shape: f32[32,32], index: 3, kind: input, shape index: {}]   ;;  %s3140_s4 = inlined_call_operand.vmem [shape: f32[1,32], index: 4, kind: input, shape index: {}]   ;;  %s3141_s5 = inlined_call_operand.vmem [shape: f32[32,32], index: 5, kind: input, shape index: {}]   ;;  %s3142_s6 = inlined_call_operand.vmem [shape: f32[1,32], index: 6, kind: input, shape index: {}]   ;;  %s3143_s7 = inlined_call_operand.hbm [shape: f32[32,32], index: 7, kind: input, shape index: {}]   ;;  %s3144_s8 = inlined_call_operand.vmem [shape: f32[1,32], index: 8, kind: input, shape index: {}]   ;;  %s3145_s9 = inlined_call_operand.vmem [shape: f32[1,32], index: 9, kind: input, shape index: {}]   ;;  %s3146_s10 = inlined_call_operand.vmem [shape: f32[1,32], index: 10, kind: input, shape index: {}]   ;;  %s3147_s11 = inlined_call_operand.vmem [shape: f32[64,32], index: 11, kind: input, shape index: {}]   ;;  %s3148_s12 = inlined_call_operand.vmem [shape: f32[1,64], index: 12, kind: input, shape index: {}]   ;;  %s3149_s13 = inlined_call_operand.hbm [shape: f32[32,64], index: 13, kind: input, shape index: {}]   ;;  %s3150_s14 = inlined_call_operand.vmem [shape: f32[1,32], index: 14, kind: input, shape index: {}]   ;;  %s3151_s15 = inlined_call_operand.vmem [shape: f32[1,32], index: 15, kind: input, shape index: {}]   ;;  %s3152_s16 = inlined_call_operand.vmem [shape: f32[1,32], index: 16, kind: input, shape index: {}]   ;;  %s3153_s17 = inlined_call_operand.hbm [shape: f32[2,8,32], index: 17, kind: output, shape index: {}]  }
   0x1   :  { %3163 = sst [smem:[#allocation15_spill]] %s3136_s0 }
   0x2   :  { %3164 = sst [smem:[#allocation16_spill]] %s3137_s1 }
   0x3   :  { %3165 = sst [smem:[#allocation17_spill]] %s3138_s2 }
   0x4   :  { %3166 = sst [smem:[#allocation18_spill]] %s3139_s3 }
   0x5   :  { %3167 = sst [smem:[#allocation19_spill]] %s3143_s7 }
   0x6   :  { %3168 = sst [smem:[#allocation20_spill]] %s3148_s12 }
   0x7   :  { %3169 = sst [smem:[#allocation21_spill]] %s3150_s14 }
   0x8   :  { %3170 = sst [smem:[#allocation22_spill]] %s3151_s15 }
   0x9   :  { %3171 = sst [smem:[#allocation23_spill]] %s3152_s16 }
   0xa   :  { %3172 = sst [smem:[#allocation24_spill]] %s3153_s17 }
   0xb   :  { %22 = vsyncpa [#allocation4], 0 }
   0xc   :  { %24 = vsyncpa [#allocation4 + $0x1], 0 }
   0xd   :  { %25 = vsyncpa [#allocation7], 0 }
   0xe   :  { %26 = vsyncpa [#allocation5], 0 }
   0xf   :  { %28 = vsyncpa [#allocation5 + $0x1], 0  ;;  %s2684_s24 = smov 0   ;;  %s2686_s25 = smov 0  }
  0x10   :  { %s2688_s26 = smov 0   ;;  %s2690_s27 = smov 0  }
  0x11 LB: > { %3173 = sst [smem:[#allocation13_spill]] %s2565_s24  ;;  %s2705_s28 = sadd.s32 4294967295, %s2577_s27   ;;  %s2577_s27 = sphi %s2690_s27, %s3205_s27   ;;  %s2573_s26 = sphi %s2688_s26, %s3204_s26   ;;  %s2569_s25 = sphi %s2686_s25, %s3203_s25   ;;  %s2565_s24 = sphi %s2684_s24, %s3202_s24  }
  0x12   : > { %s2031_s29 = sadd.s32 4294967294, %s2577_s27   ;;  %p54_p0 = scmp.ne.s32.totalorder %s2569_s25, %s2565_s24 }
  0x13   : > { %p3159_p1 = scmp.eq.s32.totalorder %s2705_s28, 0  ;;  %p420_p3 = scmp.eq.s32.totalorder %s2031_s29, 1 }
  0x14   : > { %p2032_p5 = scmp.ge.s32.totalorder %s2577_s27, 1  ;;  %p427_p7 = scmp.lt.s32.totalorder %s2577_s27, 3 }
  0x15   : > { %p2714_p4 = por %p3159_p1, %p54_p0  ;;  %p2719_p6 = por %p420_p3, %p54_p0 }
  0x16   : > { %p2724_p8 = pnand %p2032_p5, %p427_p7  ;;  %s2579_s19 = smov [#allocation6]  }
  0x17   : > { %s3174_s0 = scalar_select %p2714_p4, 1, 0 }
  0x18   : > { %s3175_s30 = scalar_select %p2719_p6, 1, 0 }
  0x19   : > { %s457_s1 = sshll.u32 %s2579_s19, 4  ;;  %p2335_p9 = pneg %p2724_p8  ;;  %s2728_s1 = int_to_ptr.vmem [resolvable:$true] %s457_s1 }
  0x1a   : > { %3176 = sst [smem:[#allocation14_spill]] %s3175_s30  ;;  %s2580_s21 = smov [#allocation8]  }
  0x1b   : > { %p2735_p11 = pnand %p2335_p9, %p3159_p1  ;;  %s485_s22 = sshll.u32 %s2580_s21, 4  ;;  %s2739_s22 = int_to_ptr.vmem [resolvable:$true] %s485_s22 }
  0x1c   : > { %s3179_s7 = sld [smem:[#allocation19_spill]] }
  0x1d   : > { %p2423_p13 = pneg %p2735_p11 }
  0x22   : > { %s2421_s19 = scalar_lea.hbm %s3179_s7, 512 }
  0x23   : > { %p2422_p12 = scmp.ne.s32.totalorder %s3179_s7, %s2421_s19  ;;  %p2428_p5 = scmp.lt.u32.totalorder %s2421_s19, %s3179_s7 }
  0x25   : > { %p2424_p0 = pnand %p2423_p13, %p2422_p12 }
  0x27   : > { %p2425_p3 = pneg %p2424_p0 }
  0x29   : > { %p2430_p7 = pnand %p2428_p5, %p2425_p3 }
  0x2b   : > { %2433 = shalt.err (!%p2430_p7)
}
  0x2c   : > { %s2434_s21 = scalar_lea.vmem %s2728_s1, 512  ;;  %p2442_p2 = scmp.lt.s32.totalorder %s2728_s1, %s2728_s1 }
  0x2d   : > { %p2435_p9 = scmp.ne.s32.totalorder %s2728_s1, %s2434_s21  ;;  %p2443_p12 = scmp.lt.s32.totalorder %s2434_s21, %s2434_s21 }
  0x2f   : > { %p2437_p10 = pnand %p2435_p9, %p2423_p13  ;;  %p2444_p0 = por %p2443_p12, %p2442_p2 }
  0x31   : > { %p2438_p1 = pneg %p2437_p10 }
  0x33   : > { %p2445_p6 = pnand %p2444_p0, %p2438_p1 }
  0x35   : > { %2448 = shalt.err (!%p2445_p6)
}
  0x36   : > { %s2581_s16 = smov 128   ;;  %s2582_s17 = smov 8  }
  0x37   : > { %2338 = dma.hbm_to_vmem [thread:$0]  (!%p2735_p11), %s3179_s7, 512, %s2728_s1, [#allocation7], %s2581_s16, %s2581_s16, %s2582_s17  }
  0x38   : > { %s2449_s19 = scalar_lea.hbm %s3149_s13, 512 }
  0x39   : > { %p2450_p2 = scmp.ne.s32.totalorder %s3149_s13, %s2449_s19  ;;  %p2456_p10 = scmp.lt.u32.totalorder %s2449_s19, %s3149_s13 }
  0x3b   : > { %p2452_p1 = pnand %p2450_p2, %p2423_p13 }
  0x3d   : > { %p2453_p6 = pneg %p2452_p1 }
  0x3f   : > { %p2458_p3 = pnand %p2456_p10, %p2453_p6 }
  0x41   : > { %2461 = shalt.err (!%p2458_p3)
}
  0x42   : > { %s2462_s1 = scalar_lea.vmem %s2739_s22, 512  ;;  %p2470_p12 = scmp.lt.s32.totalorder %s2739_s22, %s2739_s22 }
  0x43   : > { %p2463_p5 = scmp.ne.s32.totalorder %s2739_s22, %s2462_s1  ;;  %p2471_p0 = scmp.lt.s32.totalorder %s2462_s1, %s2462_s1 }
  0x45   : > { %p2465_p7 = pnand %p2463_p5, %p2423_p13  ;;  %p2472_p2 = por %p2471_p0, %p2470_p12 }
  0x47   : > { %p2466_p9 = pneg %p2465_p7 }
  0x49   : > { %p2473_p1 = pnand %p2472_p2, %p2466_p9 }
  0x4b   : > { %2476 = shalt.err (!%p2473_p1)
}
  0x4c   : > { %2341 = dma.hbm_to_vmem [thread:$0]  (!%p2735_p11), %s3149_s13, 512, %s2739_s22, [#allocation7], %s2581_s16, %s2581_s16, %s2582_s17  }
  0x4d   : > { %s2794_s15 = sadd.s32 1, %s2577_s27   ;;  %s41_s20 = sadd.s32 1, %s2573_s26 }
  0x4e   : > { %s38_s24 = ssub.s32 %s2577_s27, %s2794_s15  ;;  %p48_p13 = scmp.ne.s32.totalorder %s2573_s26, %s2569_s25 }
  0x4f   : > { %p39_p6 = scmp.eq.s32.totalorder %s38_s24, 0  ;;  %p49_p10 = scmp.eq.s32.totalorder %s2577_s27, 0 }
  0x50   : > { %p3180_p3 = scmp.eq.s32.totalorder %s2705_s28, 1  ;;  %p2352_p7 = scmp.lt.s32.totalorder %s2577_s27, 2 }
  0x51   : > { %s2810_s23 = scalar_select %p39_p6, %s2573_s26, %s41_s20  }
  0x52   : > { %p2804_p5 = por %p3180_p3, %p48_p13  ;;  %p50_p9 = por %p49_p10, %p48_p13 }
  0x53   : > { %s508_s29 = sand.u32 1, %s2573_s26   ;;  %s2037_s22 = sshll.u32 %s2577_s27, 7 }
  0x54   : > { %s3181_s30 = scalar_select %p2804_p5, 1, 0 }
  0x55   : > { %s2036_s19 = sshll.u32 %s508_s29, 3  ;;  %s3182_s21 = sld [smem:[#allocation15_spill]] }
  0x56   : > { %s512_s12 = scalar_lea.vmem [#allocation3], %s2036_s19  ;;  %p2821_p11 = pnand %p2352_p7, %p50_p9 }
  0x57   : > { %s519_s14 = sshll.u32 %s512_s12, 4  ;;  %s509_s24 = scalar_lea.sflag [#allocation4], %s508_s29  ;;  %s2819_s14 = int_to_ptr.vmem [resolvable:$true] %s519_s14 }
  0x58   : > { %p2479_p0 = pneg %p2821_p11 }
  0x5b   : > { %s2817_s1 = scalar_lea.hbm %s3182_s21, %s2037_s22  ;;  %s2482_s16 = scalar_lea.hbm %s3182_s21, 256 }
  0x5c   : > { %s2477_s7 = scalar_lea.hbm %s2817_s1, 128  ;;  %p2483_p13 = scmp.lt.u32.totalorder %s2817_s1, %s3182_s21 }
  0x5d   : > { %p2478_p12 = scmp.ne.s32.totalorder %s2817_s1, %s2477_s7  ;;  %p2484_p6 = scmp.lt.u32.totalorder %s2482_s16, %s2477_s7 }
  0x5e   : > { %p2486_p3 = scmp.lt.u32.totalorder %s2477_s7, %s2817_s1 }
  0x5f   : > { %p2480_p2 = pnand %p2479_p0, %p2478_p12  ;;  %p2485_p10 = por %p2484_p6, %p2483_p13 }
  0x61   : > { %p2481_p1 = pneg %p2480_p2  ;;  %p2487_p7 = por %p2486_p3, %p2485_p10 }
  0x63   : > { %p2488_p9 = pnand %p2487_p7, %p2481_p1 }
  0x65   : > { %2491 = shalt.err (!%p2488_p9)
}
  0x66   : > { %s2492_s29 = scalar_lea.vmem %s2819_s14, 128  ;;  %s2583_s22 = smov [#allocation3]  }
  0x67   : > { %p2493_p12 = scmp.ne.s32.totalorder %s2819_s14, %s2492_s29  ;;  %s2497_s19 = sshll.u32 %s2583_s22, 4  ;;  %s2498_s19 = int_to_ptr.vmem [resolvable:$false] %s2497_s19 }
  0x68   : > { %s2499_s17 = scalar_lea.vmem %s2498_s19, 256  ;;  %p2500_p4 = scmp.lt.s32.totalorder %s2819_s14, %s2498_s19 }
  0x69   : > { %p2495_p2 = pnand %p2493_p12, %p2479_p0  ;;  %p2501_p13 = scmp.lt.s32.totalorder %s2499_s17, %s2492_s29 }
  0x6b   : > { %p2496_p5 = pneg %p2495_p2  ;;  %p2502_p6 = por %p2501_p13, %p2500_p4 }
  0x6d   : > { %p2503_p10 = pnand %p2502_p6, %p2496_p5 }
  0x6f   : > { %2506 = shalt.err (!%p2503_p10)
}
  0x70   : > { %2345 = dma.hbm_to_vmem [thread:$0]  (!%p2821_p11), %s2817_s1, 128, %s2819_s14, %s509_s24  }
  0x71   : > { %528 = sbr.rel (%p2724_p8) target bundleno = 2453 (0x995), region = 88  ;;  %s2853_s7 = sand.u32 (!%p2724_p8), 1, %s2569_s25  }
  0x72   : > { %s2039_s16 = sshll.u32 (!%p2724_p8), %s2853_s7, 3  ;;  %s531_s12 = scalar_lea.sflag (!%p2724_p8), [#allocation4], %s2853_s7 }
  0x73   : > { %s2859_s29 = scalar_lea.vmem (!%p2724_p8), [#allocation3], %s2039_s16  ;;  %p3184_p4 = scmp.ne.s32.totalorder (!%p2724_p8), %s3174_s0, 0 }
  0x78   : > { %2552 = dma.done.wait (%p3184_p4), %s531_s12, 128  }
  0x79   : > { %2554 = vsyncadd (%p3184_p4), %s531_s12, 4294967168  ;;  %p3185_p5 = scmp.eq.s32.totalorder %s2705_s28, 0 }
  0x7b   : > { %2556 = dma.done.wait (%p3185_p5), [#allocation7], 1024   ;;  %p3186_p8 = pmov %p3185_p5 }
  0x7c   : > { %v2584_v0 = vmov 0.0|0.0   ;;  %vm2585_vm0 = vmmov 0   ;;  %v2586_v1 = vmov 0.0   ;;  %vm605_vm1 = vcmask 261120   ;;  %s3189_s1 = sld [smem:[#allocation16_spill]]  ;;  %s3190_s3 = sld [smem:[#allocation18_spill]] }
  0x7d   : > { %2558 = vsyncadd (%p3186_p8), [#allocation7], 4294966272  ;;  %2267 = vmatprep.subr.bf16.mxu0 %v2584_v0  ;;  %2275 = vmatprep.subr.bf16.mxu1 %v2584_v0  ;;  %v2918_v15 = vld [vmem:[%s2859_s29] sm:$0xff]  ;;  %v784_v16 = vld [vmem:[%s3141_s5] sm:$0xff]  ;;  %s3191_s2 = sld [smem:[#allocation17_spill]]  ;;  %vm878_vm3 = vcmask 64512  }
  0x7e   : > { %2161 = vmatprep.mubr.msk.f32.mxu0 %vm2585_vm0, %v2586_v1  ;;  %2172 = vmatprep.mubr.msk.f32.mxu1 %vm2585_vm0, %v2586_v1  ;;  %vm2877_vm2 = vmpackc.low %vm605_vm1, %vm605_vm1  ;;  %v785_v17 = vld [vmem:[%s3141_s5 + $0x8] sm:$0xff]  ;;  %v786_v19 = vld [vmem:[%s3141_s5 + $0x10] sm:$0xff]  ;;  %s2587_s0 = smov 120   ;;  %s2588_s18 = smov 112   ;;  %vm1210_vm4 = vcmask 130112   ;;  %vm1381_vm5 = vcmask 195712  }
  0x7f   : > { %v2284_v18 = vpack.c.bf16 %v785_v17, %v784_v16  ;;  %v787_v20 = vld [vmem:[%s3141_s5 + $0x18] sm:$0xff]  ;;  %v2049_v23 = vld [vmem:[%s3140_s4] ss:$0 sm:$0xff]  ;;  %s2589_s29 = smov 104   ;;  %s2590_s24 = smov 8   ;;  %vm1552_vm6 = vcmask 261312  }
  0x80   : > { %v2288_v21 = vpack.c.bf16 %v787_v20, %v786_v19  ;;  %v2055_v32 = vld [vmem:[%s3142_s6] ss:$0 sm:$0xff]  ;;  %s2591_s22 = smov 16   ;;  %s2592_s19 = smov 24   ;;  %vm1809_vm7 = vcmask 523264  }
  0x81   : > { %vm2317_vm8 = vmpackc.low %vm1809_vm7, %vm1809_vm7  ;;  %s3194_s17 = sld [smem:[#allocation22_spill]]  ;;  %s592_s14 = scalar_lea.vmem [#allocation9], %s2039_s16 }
  0x82   : > { %v594_v3 = vld [vmem:[%s3189_s1] sm:$0xff]  ;;  %v595_v4 = vld [vmem:[%s3189_s1 + $0x8] sm:$0xff]  ;;  %v596_v9 = vld [vmem:[%s3189_s1 + $0x10] sm:$0xff]  ;;  %s1942_s20 = sshll.u32 %s592_s14, 4  ;;  %p3197_p0 = scmp.ne.s32.totalorder %s3181_s30, 0  ;;  %s3093_s20 = int_to_ptr.vmem [resolvable:$true] %s1942_s20 }
  0x83   : > { %v691_v5 = vld [vmem:[%s3190_s3] sm:$0xff]  ;;  %v2268_v6 = vpack.c.bf16 %v595_v4, %v594_v3  ;;  %v692_v7 = vld [vmem:[%s3190_s3 + $0x8] sm:$0xff]  ;;  %v597_v10 = vld [vmem:[%s3189_s1 + $0x18] sm:$0xff] }
  0x84   : > { %v2276_v8 = vpack.c.bf16 %v692_v7, %v691_v5  ;;  %v693_v11 = vld [vmem:[%s3190_s3 + $0x10] sm:$0xff]  ;;  %v694_v12 = vld [vmem:[%s3190_s3 + $0x18] sm:$0xff]  ;;  %v2272_v13 = vpack.c.bf16 %v597_v10, %v596_v9  ;;  %v2043_v22 = vld [vmem:[%s3191_s2] ss:$0 sm:$0xff]  ;;  %s3196_s2 = sld [smem:[#allocation24_spill]] }
  0x85   : > { %2270 = vmatpush3.bf16.xpose.msk.msra.mxu0 %vm2877_vm2, %v2268_v6  ;;  %v2280_v14 = vpack.c.bf16 %v694_v12, %v693_v11 }
  0x86   : > { %2278 = vmatpush3.bf16.xpose.msk.msra.mxu1 %vm2877_vm2, %v2276_v8  ;;  %2271 = vmatprep.subr.bf16.mxu0 %v2584_v0 }
  0x87   : > { %2279 = vmatprep.subr.bf16.mxu1 %v2584_v0 }
  0x8d   : > { %2274 = vmatpush3.bf16.xpose.msk.msra.mxu0 %vm2877_vm2, %v2272_v13 }
  0x8e   : > { %2282 = vmatpush3.bf16.xpose.msk.msra.mxu1 %vm2877_vm2, %v2280_v14  ;;  %2283 = vmatprep.subr.bf16.mxu0 %v2584_v0 }
  0x8f   : > { %2186 = vmatprep.subr.mxu1 %v2586_v1 }
  0x94   : > { %2162 = vmatmul.mubr.msk.f32.vlgmr.msra.gmra.mrb[0].mxu0 %vm605_vm1, %v2918_v15 }
  0x95   : > { %2173 = vmatmul.mubr.msk.f32.vlgmr.msra.gmra.mrb[0].mxu1 %vm605_vm1, %v2918_v15  ;;  %2183 = vmatprep.mubr.msk.f32.mxu0 %vm2585_vm0, %v2586_v1 }
  0x96   : > { %2188 = vmatprep.mubr.msk.f32.mxu1 %vm2585_vm0, %v2586_v1  ;;  %2286 = vmatpush3.bf16.xpose.msk.msra.mxu0 %vm2877_vm2, %v2284_v18 }
  0x97   : > { %2287 = vmatprep.subr.bf16.mxu0 %v2584_v0 }
  0x9e   : > { %2290 = vmatpush3.bf16.xpose.msk.msra.mxu0 %vm2877_vm2, %v2288_v21 }
  0x9f   : > { %2206 = vmatprep.subr.mxu0 %v2586_v1 }
  0xa5   : > { %2184 = vmatmul.mubr.msk.f32.vlgmr.msra.gmra.mrb[2].mxu0 %vm605_vm1, %v2918_v15 }
  0xa6   : > { %2208 = vmatprep.mubr.msk.f32.mxu0 %vm2585_vm0, %v2586_v1 }
 0x167   : > { %v687_v24 = vpop.f32.mrb[0].mxu0 }
 0x168   : > { %v688_v25 = vadd.f32 %v2043_v22, %v687_v24  ;;  %v780_v26 = vpop.f32.mrb[0].mxu1  ;;  %v2163_v27 = vpop.f32.mrb[1].mxu0  ;;  %v1556_v24 = vld [vmem:[#allocation6 + $0x8] sm:$0xff] }
 0x169   : > { %v781_v28 = vadd.f32 %v2049_v23, %v780_v26  ;;  %v2174_v29 = vpop.f32.mrb[1].mxu1  ;;  %v1555_v23 = vld [vmem:[#allocation6] sm:$0xff]  ;;  %v1557_v27 = vld [vmem:[#allocation6 + $0x10] sm:$0xff] }
 0x16a   : > { %v877_v30 = vmul.f32 0.35355338, %v688_v25  ;;  %v2292_v25 = vpack.c.bf16 %v1556_v24, %v1555_v23 }
 0x16b   : > { %2187 = vmatpush3.xpose.msk.msra.mxu1 %vm878_vm3, %v781_v28 }
 0x16c   : > { %1040 = vrot.lane.b32.xlu1 %v877_v30, %s2587_s0  ;;  %2191 = vmatprep.subr.mxu1 %v2586_v1 }
 0x16e   : > { %2189 = vmatmul.mubr.msk.f32.vlgmr.msra.gmra.mrb[2].mxu1 %vm878_vm3, %v877_v30 }
 0x16f   : > { %2193 = vmatprep.mubr.msk.f32.mxu1 %vm2585_vm0, %v2586_v1 }
 0x170   : > { %1214 = vrot.lane.b32.xlu1 %v781_v28, %s2588_s18 }
 0x174   : > { %1212 = vrot.lane.b32.xlu1 %v877_v30, %s2588_s18 }
 0x178   : > { %1385 = vrot.lane.b32.xlu1 %v781_v28, %s2589_s29  ;;  %v873_v33 = vpop.f32.mrb[2].mxu0 }
 0x179   : > { %v874_v35 = vadd.f32 %v2055_v32, %v873_v33  ;;  %v2185_v36 = vpop.f32.mrb[3].mxu0 }
 0x17b   : > { %2192 = vmatpush3.msra.mxu1 %v874_v35 }
 0x17c   : > { %1383 = vrot.lane.b32.xlu1 %v877_v30, %s2589_s29  ;;  %2196 = vmatprep.subr.mxu1 %v2586_v1 }
 0x180   : > { %1300 = vrot.lane.b32.xlu1 %v874_v35, %s2588_s18  ;;  %s3195_s18 = sld [smem:[#allocation23_spill]] }
 0x1de   : > { %v1041_v31 = vpop.permute.xlu1 %1040 }
 0x1e2   : > { %v1215_v34 = vpop.permute.xlu1 %1214 }
 0x1e3   : > { %2207 = vmatpush3.xpose.msk.msra.mxu0 %vm878_vm3, %v1215_v34 }
 0x1e4   : > { %2216 = vmatprep.subr.mxu0 %v2586_v1 }
 0x1e6   : > { %v1213_v37 = vpop.permute.xlu1 %1212 }
 0x1e7   : > { %2209 = vmatmul.mubr.msk.f32.vlgmr.msra.gmra.mrb[4].mxu0 %vm878_vm3, %v1213_v37 }
 0x1e8   : > { %2218 = vmatprep.mubr.msk.f32.mxu0 %vm2585_vm0, %v2586_v1 }
 0x1ea   : > { %v1386_v38 = vpop.permute.xlu1 %1385 }
 0x1eb   : > { %2217 = vmatpush3.xpose.msk.msra.mxu0 %vm878_vm3, %v1386_v38 }
 0x1ec   : > { %2291 = vmatprep.subr.bf16.mxu0 %v2584_v0 }
 0x1ee   : > { %v1384_v39 = vpop.permute.xlu1 %1383 }
 0x1ef   : > { %2219 = vmatmul.mubr.msk.f32.vlgmr.msra.gmra.mrb[6].mxu0 %vm878_vm3, %v1384_v39 }
 0x1f0   : > { %2234 = vmatprep.mubr.msk.f32.mxu0 %vm2585_vm0, %v2586_v1  ;;  %2294 = vmatpush3.bf16.xpose.msk.msra.mxu0 %vm2877_vm2, %v2292_v25 }
 0x1f1   : > { %2295 = vmatprep.subr.bf16.mxu0 %v2584_v0 }
 0x1f2   : > { %v1301_v4 = vpop.permute.xlu1 %1300 }
 0x241   : > { %v951_v40 = vpop.f32.mrb[2].mxu1 }
 0x242   : > { %v2190_v41 = vpop.f32.mrb[3].mxu1  ;;  %v955_v42 = vsel %vm878_vm3, %v951_v40, -inf }
 0x243   : > { %956 = vmax.xlane.f32.xlu0 %v955_v42 }
 0x259   : > { %1042 = vrot.lane.b32.xlu0 %v781_v28, %s2587_s0  ;;  %v1558_v28 = vld [vmem:[#allocation6 + $0x18] sm:$0xff] }
 0x25a   : > { %v2296_v29 = vpack.c.bf16 %v1558_v28, %v1557_v27 }
 0x25c   : > { %2298 = vmatpush3.bf16.xpose.msk.msra.mxu0 %vm2877_vm2, %v2296_v29 }
 0x25d   : > { %2315 = vmatprep.subr.bf16.mxu0 %v2584_v0 }
 0x2ba   : > { %v1286_v43 = vpop.f32.mrb[4].mxu0 }
 0x2bb   : > { %v2210_v44 = vpop.f32.mrb[5].mxu0  ;;  %v1290_v45 = vsel %vm878_vm3, %v1286_v43, -inf }
 0x2bc   : > { %1291 = vmax.xlane.f32.xlu0 %v1290_v45 }
 0x2c2   : > { %v1457_v46 = vpop.f32.mrb[6].mxu0 }
 0x2c3   : > { %v2220_v47 = vpop.f32.mrb[7].mxu0  ;;  %v1461_v48 = vsel %vm878_vm3, %v1457_v46, -inf }
 0x2c4   : > { %1462 = vmax.xlane.f32.xlu1 %v1461_v48  ;;  %v1686_v47 = vld [vmem:[%s3147_s11 + $0x8] sm:$0xff] }
 0x2d0   : > { %v957_v49 = vpop.xlane.xlu0 %956 }
 0x2d1   : > { %v958_v50 = vsub.f32 %v951_v40, %v957_v49  ;;  %v2073_v49 = vld [vmem:[%s3144_s8] ss:$0 sm:$0xff] }
 0x2d2   : > { %1129 = vrot.lane.b32.xlu0 %v874_v35, %s2587_s0 }
 0x2d3   : > { %v959_v51 = vmul.f32 1.442695, %v958_v50 }
 0x2d4   : > { %v1043_v53 = vpop.permute.xlu0 %1042 }
 0x2d5   : > { %2401 = vpow2.f32 %v959_v51 }
 0x2df   : > { %v2402_v52 = vpop.eup %2401 }
 0x2e0   : > { %2194 = vmatmul.mubr.msk.f32.vlgmr.msra.gmra.mrb[4].mxu1 %vm878_vm3, %v2402_v52  ;;  %v961_v17 = vsel %vm878_vm3, %v2402_v52, 0.0 }
 0x2e1   : > { %2197 = vmatpush3.xpose.msk.msra.mxu1 %vm878_vm3, %v1043_v53  ;;  %2198 = vmatprep.mubr.msk.f32.mxu1 %vm2585_vm0, %v2586_v1 }
 0x2e2   : > { %2201 = vmatprep.subr.mxu1 %v2586_v1 }
 0x2e4   : > { %2199 = vmatmul.mubr.msk.f32.vlgmr.msra.gmra.mrb[6].mxu1 %vm878_vm3, %v1041_v31 }
 0x2e5   : > { %2203 = vmatprep.mubr.msk.f32.mxu1 %vm2585_vm0, %v2586_v1 }
 0x349   : > { %v1292_v54 = vpop.xlane.xlu0 %1291 }
 0x34a   : > { %v1293_v55 = vsub.f32 %v1286_v43, %v1292_v54 }
 0x34c   : > { %v1294_v62 = vmul.f32 1.442695, %v1293_v55 }
 0x34d   : > { %v1130_v56 = vpop.permute.xlu0 %1129 }
 0x34e   : > { %2202 = vmatpush3.msra.mxu1 %v1130_v56  ;;  %2403 = vpow2.f32 %v1294_v62  ;;  %v1687_v56 = vld [vmem:[%s3147_s11 + $0x10] sm:$0xff]  ;;  %v1692_v62 = vld [vmem:[%s3147_s11 + $0x38] sm:$0xff] }
 0x34f   : > { %2211 = vmatprep.subr.mxu1 %v2586_v1 }
 0x351   : > { %v1463_v5 = vpop.xlane.xlu1 %1462 }
 0x352   : > { %v1464_v6 = vsub.f32 %v1457_v46, %v1463_v5  ;;  %v1685_v46 = vld [vmem:[%s3147_s11] sm:$0xff] }
 0x353   : > { %v2300_v48 = vpack.c.bf16 %v1686_v47, %v1685_v46  ;;  %v2098_v46 = vld [vmem:[%s3195_s18] ss:$0 sm:$0xff] }
 0x354   : > { %v1465_v9 = vmul.f32 1.442695, %v1464_v6  ;;  %v1800_v6 = vld [vmem:[#allocation8 + $0x10] sm:$0xff] }
 0x358   : > { %v2404_v63 = vpop.eup %2403 }
 0x359   : > { %v1296_v3 = vsel %vm878_vm3, %v2404_v63, 0.0 }
 0x3b3   : > { %v1034_v57 = vpop.f32.mrb[4].mxu1 }
 0x3b4   : > { %v2195_v58 = vpop.f32.mrb[5].mxu1 }
 0x3b7   : > { %v1114_v59 = vpop.f32.mrb[6].mxu1 }
 0x3b8   : > { %v2200_v60 = vpop.f32.mrb[7].mxu1  ;;  %v1118_v61 = vsel %vm878_vm3, %v1114_v59, -inf }
 0x3b9   : > { %1119 = vmax.xlane.f32.xlu1 %v1118_v61  ;;  %v1691_v61 = vld [vmem:[%s3147_s11 + $0x30] sm:$0xff] }
 0x3ca   : > { %1471 = vrot.lane.b32.xlu1 %v874_v35, %s2589_s29  ;;  %s3192_s29 = sld [smem:[#allocation20_spill]] }
 0x3ee   : > { %1297 = vadd.xlane.f32.xlu1 %v1296_v3  ;;  %v1798_v3 = vld [vmem:[#allocation8] sm:$0xff] }
 0x446   : > { %v1120_v7 = vpop.xlane.xlu1 %1119 }
 0x447   : > { %v1121_v8 = vsub.f32 %v1114_v59, %v1120_v7  ;;  %v1690_v59 = vld [vmem:[%s3147_s11 + $0x28] sm:$0xff]  ;;  %v1801_v7 = vld [vmem:[#allocation8 + $0x18] sm:$0xff] }
 0x449   : > { %v1122_v10 = vmul.f32 1.442695, %v1121_v8  ;;  %v2320_v8 = vpack.c.bf16 %v1801_v7, %v1800_v6 }
 0x44a   : > { %v1472_v14 = vpop.permute.xlu1 %1471 }
 0x44b   : > { %2405 = vpow2.f32 %v1122_v10 }
 0x44c   : > { %2407 = vpow2.f32 %v1465_v9 }
 0x455   : > { %v2406_v11 = vpop.eup %2405 }
 0x456   : > { %2204 = vmatmul.mubr.msk.f32.vlgmr.msra.gmra.mrb[8].mxu1 %vm878_vm3, %v2406_v11  ;;  %v1124_v12 = vsel %vm878_vm3, %v2406_v11, 0.0  ;;  %v2408_v13 = vpop.eup %2407 }
 0x457   : > { %2212 = vmatpush3.msra.mxu1 %v1301_v4  ;;  %1125 = vadd.xlane.f32.xlu0 %v1124_v12  ;;  %v1467_v16 = vsel %vm878_vm3, %v2408_v13, 0.0  ;;  %v1799_v4 = vld [vmem:[#allocation8 + $0x8] sm:$0xff] }
 0x458   : > { %2213 = vmatprep.mubr.msk.f32.mxu1 %vm2585_vm0, %v2586_v1  ;;  %2221 = vmatprep.subr.mxu1 %v2586_v1  ;;  %v2316_v5 = vpack.c.bf16 %v1799_v4, %v1798_v3 }
 0x45a   : > { %2214 = vmatmul.mubr.msk.f32.vlgmr.msra.gmra.mrb[10].mxu1 %vm878_vm3, %v2404_v63  ;;  %v2312_v63 = vpack.c.bf16 %v1692_v62, %v1691_v61 }
 0x45b   : > { %2222 = vmatpush3.msra.mxu1 %v1472_v14  ;;  %1468 = vadd.xlane.f32.xlu0 %v1467_v16 }
 0x45c   : > { %2223 = vmatprep.mubr.msk.f32.mxu1 %vm2585_vm0, %v2586_v1  ;;  %2299 = vmatprep.subr.bf16.mxu1 %v2584_v0 }
 0x45e   : > { %2224 = vmatmul.mubr.msk.f32.vlgmr.msra.gmra.mrb[12].mxu1 %vm878_vm3, %v2408_v13 }
 0x45f   : > { %962 = vadd.xlane.f32.xlu0 %v961_v17  ;;  %2253 = vmatprep.mubr.msk.f32.mxu1 %vm2585_vm0, %v2586_v1 }
 0x462   : > { %2302 = vmatpush3.bf16.xpose.msk.msra.mxu1 %vm2877_vm2, %v2300_v48 }
 0x463   : > { %2303 = vmatprep.subr.bf16.mxu1 %v2584_v0 }
 0x47b   : > { %v1298_v26 = vpop.xlane.xlu1 %1297 }
 0x4e4   : > { %v1126_v18 = vpop.xlane.xlu0 %1125 }
 0x4e8   : > { %v1469_v19 = vpop.xlane.xlu0 %1468 }
 0x4ec   : > { %v963_v20 = vpop.xlane.xlu0 %962 }
 0x4ed   : > { %2409 = vrcp.f32 %v963_v20 }
 0x4ee   : > { %2411 = vrcp.f32 %v1126_v18  ;;  %v2079_v18 = vld [vmem:[%s3145_s9] ss:$0 sm:$0xff] }
 0x4ef   : > { %2413 = vrcp.f32 %v1298_v26 }
 0x4f0   : > { %2415 = vrcp.f32 %v1469_v19 }
 0x4f7   : > { %v2410_v21 = vpop.eup %2409 }
 0x4f8   : > { %v1038_v22 = vmul.f32 %v2410_v21, %v1034_v57  ;;  %v2412_v30 = vpop.eup %2411  ;;  %v1688_v57 = vld [vmem:[%s3147_s11 + $0x18] sm:$0xff] }
 0x4f9   : > { %v2414_v34 = vpop.eup %2413  ;;  %v2304_v58 = vpack.c.bf16 %v1688_v57, %v1687_v56 }
 0x4fa   : > { %1039 = vst.msk [vmem:[#allocation2] sm:$0xff] %vm878_vm3, %v1038_v22  ;;  %v2416_v38 = vpop.eup %2415  ;;  %v2081_v22 = vld [vmem:[%s3192_s29] ss:$0 sm:$0xff]  ;;  %s2100_s29 = sshll.u32 %s2705_s28, 7  ;;  %s2593_s28 = smov [#allocation9]  }
 0x4fb   : > { %2306 = vmatpush3.bf16.xpose.msk.msra.mxu1 %vm2877_vm2, %v2304_v58  ;;  %s3091_s3 = scalar_lea.hbm %s3196_s2, %s2100_s29  ;;  %s2511_s16 = sshll.u32 %s2593_s28, 4  ;;  %s2512_s16 = int_to_ptr.vmem [resolvable:$false] %s2511_s16 }
 0x4fc   : > { %2307 = vmatprep.subr.bf16.mxu1 %v2584_v0  ;;  %p2514_p7 = scmp.lt.s32.totalorder %s3093_s20, %s2512_s16 }
 0x529   : > { %v1201_v31 = vpop.f32.mrb[8].mxu1 }
 0x52a   : > { %v1205_v32 = vmul.f32 %v2412_v30, %v1201_v31  ;;  %v2205_v33 = vpop.f32.mrb[9].mxu1 }
 0x52c   : > { %1207 = vrot.lane.b32.xlu1 %v1205_v32, %s2590_s24  ;;  %s3193_s24 = sld [smem:[#allocation21_spill]] }
 0x52d   : > { %v1372_v35 = vpop.f32.mrb[10].mxu1 }
 0x52e   : > { %v1376_v36 = vmul.f32 %v2414_v34, %v1372_v35  ;;  %v2215_v37 = vpop.f32.mrb[11].mxu1 }
 0x530   : > { %1378 = vrot.lane.b32.xlu0 %v1376_v36, %s2591_s22  ;;  %s1929_s22 = scalar_lea.sflag [#allocation5], %s2853_s7 }
 0x531   : > { %v1543_v39 = vpop.f32.mrb[12].mxu1 }
 0x532   : > { %v1547_v40 = vmul.f32 %v2416_v38, %v1543_v39  ;;  %v2225_v41 = vpop.f32.mrb[13].mxu1  ;;  %v2091_v27 = vld [vmem:[%s3193_s24] ss:$0 sm:$0xff] }
 0x534   : > { %1549 = vrot.lane.b32.xlu1 %v1547_v40, %s2592_s19  ;;  %s2507_s19 = scalar_lea.vmem %s3093_s20, 128 }
 0x535   : > { %p2508_p11 = scmp.ne.s32.totalorder %s3093_s20, %s2507_s19 }
 0x537   : > { %p2509_p1 = pnand %p2508_p11, %p3197_p0 }
 0x539   : > { %p2510_p3 = pneg %p2509_p1 }
 0x59e   : > { %v1208_v42 = vpop.permute.xlu1 %1207 }
 0x59f   : > { %1211 = vst.msk [vmem:[#allocation2] sm:$0xff] %vm1210_vm4, %v1208_v42 }
 0x5a2   : > { %v1379_v43 = vpop.permute.xlu0 %1378 }
 0x5a3   : > { %1382 = vst.msk [vmem:[#allocation2] sm:$0xff] %vm1381_vm5, %v1379_v43 }
 0x5a6   : > { %v1550_v44 = vpop.permute.xlu1 %1549 }
 0x5a7   : > { %1553 = vst.msk [vmem:[#allocation2] sm:$0xff] %vm1552_vm6, %v1550_v44  ;;  %v2097_v44 = vld [vmem:[%s3194_s17] ss:$0 sm:$0xff]  ;;  %s2513_s17 = scalar_lea.vmem %s2512_s16, 256 }
 0x5a8   : > { %p2515_p9 = scmp.lt.s32.totalorder %s2513_s17, %s2507_s19 }
 0x5aa   : > { %p2516_p12 = por %p2515_p9, %p2514_p7 }
 0x5ac   : > { %p2517_p2 = pnand %p2516_p12, %p2510_p3 }
 0x5ae   : > { %v1554_v45 = vld [vmem:[#allocation2] sm:$0xff] }
 0x5af   : > { %2235 = vmatmul.mubr.msk.f32.vlgmr.msra.gmra.mrb[8].mxu0 %vm605_vm1, %v1554_v45 }
 0x5b0   : > { %2264 = vmatprep.mubr.msk.f32.mxu0 %vm2585_vm0, %v2586_v1  ;;  %2318 = vmatpush3.bf16.xpose.msk.msra.mxu0 %vm2317_vm8, %v2316_v5 }
 0x5b1   : > { %2319 = vmatprep.subr.bf16.mxu0 %v2584_v0 }
 0x5b8   : > { %2322 = vmatpush3.bf16.xpose.msk.msra.mxu0 %vm2317_vm8, %v2320_v8 }
 0x682   : > { %v1647_v50 = vpop.f32.mrb[8].mxu0 }
 0x683   : > { %v1648_v1 = vadd.f32 %v2073_v49, %v1647_v50  ;;  %v2236_v51 = vpop.f32.mrb[9].mxu0 }
 0x685   : > { %v1652_v52 = vadd.f32 %v1648_v1, %v2918_v15  ;;  %v1689_v15 = vld [vmem:[%s3147_s11 + $0x20] sm:$0xff] }
 0x686   : > { %v2308_v60 = vpack.c.bf16 %v1690_v59, %v1689_v15 }
 0x687   : > { %v1655_v53 = vsel %vm605_vm1, %v1652_v52, 0.0  ;;  %v1660_v54 = vmul.f32 %v1652_v52, %v1652_v52 }
 0x688   : > { %1656 = vadd.xlane.f32.xlu1 %v1655_v53  ;;  %2310 = vmatpush3.bf16.xpose.msk.msra.mxu1 %vm2877_vm2, %v2308_v60 }
 0x689   : > { %v1661_v55 = vsel %vm605_vm1, %v1660_v54, 0.0  ;;  %2311 = vmatprep.subr.bf16.mxu1 %v2584_v0  ;;  %v2080_v0 = vld [vmem:[%s3146_s10] ss:$0 sm:$0xff] }
 0x68a   : > { %1662 = vadd.xlane.f32.xlu0 %v1661_v55 }
 0x690   : > { %2314 = vmatpush3.bf16.xpose.msk.msra.mxu1 %vm2877_vm2, %v2312_v63 }
 0x715   : > { %v1657_v9 = vpop.xlane.xlu1 %1656 }
 0x716   : > { %v1659_v10 = vmul.f32 0.03125, %v1657_v9 }
 0x717   : > { %v1663_v11 = vpop.xlane.xlu0 %1662 }
 0x718   : > { %v1665_v12 = vmul.f32 %v1659_v10, %v1659_v10  ;;  %v1664_v2 = vmul.f32 0.03125, %v1663_v11  ;;  %v1667_v16 = vsub.f32 %v1652_v52, %v1659_v10 }
 0x71a   : > { %v1666_v13 = vsub.f32 %v1664_v2, %v1665_v12 }
 0x71c   : > { %v1668_v14 = vadd.f32 1e-05, %v1666_v13 }
 0x71e   : > { %2417 = vrsqrt.f32 %v1668_v14 }
 0x728   : > { %v2418_v17 = vpop.eup %2417 }
 0x729   : > { %v1670_v19 = vmul.f32 %v2418_v17, %v1667_v16 }
 0x72b   : > { %v1677_v20 = vmul.f32 %v2079_v18, %v1670_v19 }
 0x72d   : > { %v1684_v21 = vadd.f32 %v2080_v0, %v1677_v20 }
 0x72f   : > { %2254 = vmatmul.mubr.msk.f32.vlgmr.msra.gmra.mrb[14].mxu1 %vm605_vm1, %v1684_v21 }
 0x802   : > { %v1793_v23 = vpop.f32.mrb[14].mxu1 }
 0x803   : > { %v1794_v24 = vadd.f32 %v2081_v22, %v1793_v23  ;;  %v2255_v25 = vpop.f32.mrb[15].mxu1 }
 0x805   : > { %v1797_v26 = vmax.f32 %v1794_v24, 0.0 }
 0x807   : > { %2265 = vmatmul.mubr.msk.f32.vlgmr.msra.gmra.mrb[10].mxu0 %vm1809_vm7, %v1797_v26 }
 0x8da   : > { %v1891_v28 = vpop.f32.mrb[10].mxu0 }
 0x8db   : > { %v1892_v29 = vadd.f32 %v2091_v27, %v1891_v28  ;;  %v2266_v30 = vpop.f32.mrb[11].mxu0 }
 0x8dd   : > { %v1895_v31 = vadd.f32 %v1892_v29, %v1684_v21 }
 0x8df   : > { %v1898_v32 = vsel %vm605_vm1, %v1895_v31, 0.0  ;;  %v1902_v33 = vmul.f32 %v1895_v31, %v1895_v31 }
 0x8e0   : > { %1899 = vadd.xlane.f32.xlu0 %v1898_v32 }
 0x8e1   : > { %v1903_v34 = vsel %vm605_vm1, %v1902_v33, 0.0 }
 0x8e2   : > { %1904 = vadd.xlane.f32.xlu1 %v1903_v34 }
 0x96d   : > { %v1900_v35 = vpop.xlane.xlu0 %1899 }
 0x96e   : > { %v1901_v36 = vmul.f32 0.03125, %v1900_v35 }
 0x96f   : > { %v1905_v37 = vpop.xlane.xlu1 %1904 }
 0x970   : > { %v1907_v38 = vmul.f32 %v1901_v36, %v1901_v36  ;;  %v1906_v39 = vmul.f32 0.03125, %v1905_v37  ;;  %v1909_v42 = vsub.f32 %v1895_v31, %v1901_v36 }
 0x972   : > { %v1908_v40 = vsub.f32 %v1906_v39, %v1907_v38 }
 0x974   : > { %v1910_v41 = vadd.f32 1e-05, %v1908_v40 }
 0x976   : > { %2419 = vrsqrt.f32 %v1910_v41 }
 0x980   : > { %v2420_v43 = vpop.eup %2419 }
 0x981   : > { %v1912_v45 = vmul.f32 %v2420_v43, %v1909_v42 }
 0x983   : > { %v1919_v47 = vmul.f32 %v2097_v44, %v1912_v45 }
 0x985   : > { %v1926_v48 = vadd.f32 %v2098_v46, %v1919_v47 }
 0x987   : > { %1927 = vst.msk [vmem:[%s592_s14] sm:$0xff] %vm605_vm1, %v1926_v48 }
 0x988   : > { %2520 = shalt.err (!%p2517_p2)
}
 0x989   : > { %s2521_s7 = scalar_lea.hbm %s3091_s3, 128  ;;  %s2525_s0 = scalar_lea.hbm %s3196_s2, 256 }
 0x98a   : > { %p2522_p13 = scmp.ne.s32.totalorder %s3091_s3, %s2521_s7  ;;  %p2526_p4 = scmp.lt.u32.totalorder %s3091_s3, %s3196_s2 }
 0x98b   : > { %p2527_p5 = scmp.lt.u32.totalorder %s2525_s0, %s2521_s7  ;;  %p2529_p11 = scmp.lt.u32.totalorder %s2521_s7, %s3091_s3 }
 0x98c   : > { %p2523_p6 = pnand %p2522_p13, %p3197_p0 }
 0x98d   : > { %p2528_p8 = por %p2527_p5, %p2526_p4 }
 0x98e   : > { %p2524_p10 = pneg %p2523_p6 }
 0x98f   : > { %p2530_p1 = por %p2529_p11, %p2528_p8 }
 0x991   : > { %p2531_p3 = pnand %p2530_p1, %p2524_p10 }
 0x993   : > { %2534 = shalt.err (!%p2531_p3)
}
 0x994   : > { %2333 = dma.vmem_to_hbm [thread:$0]  (%p3197_p0), %s3093_s20, 128, %s3091_s3, %s1929_s22  }
 0x995 PF: > { %s3198_s14 = sld [smem:[#allocation13_spill]]  ;;  %s3199_s24 = sld [smem:[#allocation14_spill]] }
 0x996   : > { %p3201_p9 = scmp.ge.s32.totalorder %s2577_s27, 2 }
 0x99b   : > { %s1954_s19 = sand.u32 1, %s3198_s14   ;;  %p3200_p7 = scmp.ne.s32.totalorder %s3199_s24, 0 }
 0x99c   : > { %s1955_s28 = scalar_lea.sflag [#allocation5], %s1954_s19 }
 0x99d   : > { %p2347_p12 = pnand %p3201_p9, %p3200_p7 }
 0x99f   : > { %2560 = dma.done.wait (!%p2347_p12), %s1955_s28, 128  }
 0x9a0   : > { %2562 = vsyncadd (!%p2347_p12), %s1955_s28, 4294967168  ;;  %p31_p2 = scmp.ge.s32.totalorder %s2794_s15, 4   ;;  %s3202_s24 = smov %s2569_s25 }
 0x9a1   : > { %s3203_s25 = smov %s2573_s26  ;;  %s3204_s26 = smov %s2810_s23 }
 0x9a2   : > { %s3205_s27 = smov %s2794_s15  ;;  %33 = sbr.rel (!%p31_p2) target bundleno = 17 (0x11), region = 141 }
 0x9a9   :  { %1960 = vsyncpa [#allocation4], 1 }
 0x9aa   :  { %1962 = vsyncpa [#allocation4 + $0x1], 1 }
 0x9ab   :  { %1963 = vsyncpa [#allocation7], 1 }
 0x9ac   :  { %1964 = vsyncpa [#allocation5], 1 }
 0x9ad   :  { %1966 = vsyncpa [#allocation5 + $0x1], 1 }

</bundles_post_ra>
